<compile_context>
chip_gen: v7x
topology: tpu7x:2x2x1
jax: 0.10.0
libtpu: 0.0.40
codegen_flags: <defaults>
</compile_context>

<pallas_src>
import functools

import jax
import jax.numpy as jnp
import numpy as np
from jax.experimental import pallas as pl
from jax.experimental.pallas import tpu as pltpu


def _iou_label_kernel(rows_ref, cols_ref, cw_ref, ch_ref, tgt_ref, feat_ref,
                      out_ref, *, radius, size):
    """One batch block: feat (TB, 4, W*H) -> iou map (TB, W*H)."""
    S = size
    r = radius

    rows = rows_ref[...]            # (1, WH) int32: flat_idx // S
    cols = cols_ref[...]            # (1, WH) int32: flat_idx % S
    cw = cw_ref[...]                # (TB, 1) int32 centre column
    ch = ch_ref[...]                # (TB, 1) int32 centre row
    tgt = tgt_ref[...]              # (TB, 4) f32
    t0 = tgt[:, 0:1]                # target left
    t1 = tgt[:, 1:2]                # target right
    t2 = tgt[:, 2:3]                # target top
    t3 = tgt[:, 3:4]                # target bottom

    # Positions that receive a scatter write: the clamped (2r+1)^2 window.
    row_lo = jnp.maximum(ch - r, 0)
    row_hi = jnp.minimum(ch + r, S - 1)
    col_lo = jnp.maximum(cw - r, 0)
    col_hi = jnp.minimum(cw + r, S - 1)
    written = ((rows >= row_lo) & (rows <= row_hi)
               & (cols >= col_lo) & (cols <= col_hi))          # (TB, WH)

    # Effective (last-written) offsets per position. For the low border the
    # last offset in ascending loop order equals pos - centre; for the high
    # border (clamped from above) the last offset is +radius.
    r_h = jnp.where(rows == S - 1, r, rows - ch).astype(jnp.float32)
    r_w = jnp.where(cols == S - 1, r, cols - cw).astype(jnp.float32)

    # Shifted target box (left, right, top, bottom distances).
    tl = t0 + r_w
    tr = t1 - r_w
    tt = t2 + r_h
    tb = t3 - r_h

    # Prediction planes at every position (channel order: l, r, t, b).
    p_l = feat_ref[:, 0, :]
    p_r = feat_ref[:, 1, :]
    p_t = feat_ref[:, 2, :]
    p_b = feat_ref[:, 3, :]

    target_area = (tl + tr) * (tt + tb)
    pred_area = (p_l + p_r) * (p_t + p_b)
    w_intersect = jnp.minimum(p_l, tl) + jnp.minimum(p_r, tr)
    h_intersect = jnp.minimum(p_b, tb) + jnp.minimum(p_t, tt)
    area_intersect = w_intersect * h_intersect
    area_union = target_area + pred_area - area_intersect
    iou = (area_intersect + 1.0) * pl.reciprocal(area_union + 1.0, approx=False)

    out_ref[...] = jnp.where(written, iou, jnp.float32(-1.0))


def iou_label_pred(output, ind, target, radius=5, block_batch=16):
    """Pallas implementation of IouLabelPred.forward (norm=False path).

    output: (num_images, num_sequences, 4, W, H) float
    ind:    (num_images, num_sequences, 1) int
    target: (num_images, num_sequences, 4) float
    returns (num_images, num_sequences, W, H) float32 iou map
    """
    ni, ns, C, W, H = output.shape
    assert C == 4 and W == H, "IouLabelPred kernel assumes 4 channels and W == H"
    B = ni * ns
    WH = W * H

    # Lane-dense, free reshapes (contiguous dims only).
    feat = output.reshape(B, C, WH).astype(jnp.float32)
    ind_flat = ind.reshape(B).astype(jnp.int32)
    tgt = target.reshape(B, C).astype(jnp.float32)

    # Per-element centres, precomputed on tiny arrays (keeps integer div/mod
    # out of the kernel).
    cw = (ind_flat % W).reshape(B, 1)
    ch = (ind_flat // W).reshape(B, 1)

    # Precomputed row / column index planes for the flattened spatial axis.
    flat = jnp.arange(WH, dtype=jnp.int32)
    rows_flat = (flat // W).reshape(1, WH)
    cols_flat = (flat % W).reshape(1, WH)

    # Batch tile (sublane aligned). Pad the batch to a multiple of TB; padded
    # rows compute garbage that is sliced off afterwards.
    TB = max(8, 8 * ((int(block_batch) + 7) // 8))
    nb = pl.cdiv(B, TB)
    B_pad = nb * TB
    if B_pad != B:
        pad = B_pad - B
        feat = jnp.pad(feat, ((0, pad), (0, 0), (0, 0)))
        cw = jnp.pad(cw, ((0, pad), (0, 0)))
        ch = jnp.pad(ch, ((0, pad), (0, 0)))
        tgt = jnp.pad(tgt, ((0, pad), (0, 0)))

    kernel = functools.partial(_iou_label_kernel, radius=radius, size=W)

    iou_map = pl.pallas_call(
        kernel,
        out_shape=jax.ShapeDtypeStruct((B_pad, WH), jnp.float32),
        grid=(nb,),
        in_specs=[
            pl.BlockSpec((1, WH), lambda i: (0, 0)),          # rows (constant)
            pl.BlockSpec((1, WH), lambda i: (0, 0)),          # cols (constant)
            pl.BlockSpec((TB, 1), lambda i: (i, 0)),          # centre_w
            pl.BlockSpec((TB, 1), lambda i: (i, 0)),          # centre_h
            pl.BlockSpec((TB, C), lambda i: (i, 0)),          # target boxes
            pl.BlockSpec((TB, C, WH), lambda i: (i, 0, 0)),   # prediction maps
        ],
        out_specs=pl.BlockSpec((TB, WH), lambda i: (i, 0)),
        compiler_params=pltpu.CompilerParams(
            dimension_semantics=("parallel",)),
    )(rows_flat, cols_flat, cw, ch, tgt, feat)

    return iou_map[:B].reshape(ni, ns, W, H)


def _reference(output, ind, target, radius=5):
    """NumPy port of the PyTorch forward (norm=False) for verification."""
    output = np.asarray(output, np.float32)
    ni, ns, C, W, H = output.shape
    B = ni * ns
    out = output.reshape(B, C, W, H)
    tgt = np.asarray(target, np.float32).reshape(B, C)
    indv = np.asarray(ind, np.int64).reshape(B)

    iou_map = np.zeros((B, W * H), np.float32) - 1.0
    center_w = indv % W
    center_h = indv // W
    batch = np.arange(B)

    for r_w in range(-radius, radius + 1):
        for r_h in range(-radius, radius + 1):
            tl = tgt[:, 0] + r_w
            tr = tgt[:, 1] - r_w
            tt = tgt[:, 2] + r_h
            tb = tgt[:, 3] - r_h
            h_cl = np.clip(center_h + r_h, 0, W - 1)
            w_cl = np.clip(center_w + r_w, 0, W - 1)
            ind_curr = h_cl * W + w_cl
            # _tranpose_and_gather_feat: permute(0,2,3,1).view(B,-1,4) gather
            pred = out[batch, :, ind_curr // H, ind_curr % H]  # (B, 4)
            p_l, p_r, p_t, p_b = pred[:, 0], pred[:, 1], pred[:, 2], pred[:, 3]
            target_area = (tl + tr) * (tt + tb)
            pred_area = (p_l + p_r) * (p_t + p_b)
            w_i = np.minimum(p_l, tl) + np.minimum(p_r, tr)
            h_i = np.minimum(p_b, tb) + np.minimum(p_t, tt)
            a_i = w_i * h_i
            a_u = target_area + pred_area - a_i
            iou = (a_i + 1.0) / (a_u + 1.0)
            iou_map[batch, ind_curr] = iou
    return iou_map.reshape(ni, ns, W, H)


if __name__ == "__main__":
    key = jax.random.PRNGKey(0)
    k1, k2, k3, k4, k5 = jax.random.split(key, 5)

    # --- test 1: batched batch (multiple grid steps), border centres --------
    ni, ns, C, S = 4, 8, 4, 16
    radius = 5
    output = jax.random.uniform(k1, (ni, ns, C, S, S), jnp.float32,
                                minval=0.0, maxval=10.0)
    target = jax.random.uniform(k2, (ni, ns, C), jnp.float32,
                                minval=2.0, maxval=10.0)
    ind = jax.random.randint(k3, (ni, ns, 1), 0, S * S, dtype=jnp.int32)
    # Force border / corner centres to exercise the clamp-overwrite path.
    ind = ind.at[0, 0, 0].set(0)
    ind = ind.at[0, 1, 0].set(S * S - 1)
    ind = ind.at[1, 0, 0].set(S - 1)
    ind = ind.at[1, 1, 0].set((S - 1) * S)

    result = jax.block_until_ready(
        iou_label_pred(output, ind, target, radius=radius))
    ref = _reference(np.asarray(output), np.asarray(ind), np.asarray(target),
                     radius=radius)
    np.testing.assert_allclose(np.asarray(result), ref, rtol=1e-5, atol=1e-5)

    # --- test 2: radius > S/2 (window covers most of map), padded batch -----
    ni2, ns2, radius2 = 2, 2, 9
    output2 = jax.random.uniform(k4, (ni2, ns2, C, S, S), jnp.float32,
                                 minval=0.0, maxval=10.0)
    target2 = jax.random.uniform(k5, (ni2, ns2, C), jnp.float32,
                                 minval=2.0, maxval=10.0)
    ind2 = jnp.array([[[0], [S * S - 1]],
                      [[S - 1], [(S // 2) * S + S // 2]]], dtype=jnp.int32)
    result2 = jax.block_until_ready(
        iou_label_pred(output2, ind2, target2, radius=radius2))
    ref2 = _reference(np.asarray(output2), np.asarray(ind2),
                      np.asarray(target2), radius=radius2)
    np.testing.assert_allclose(np.asarray(result2), ref2, rtol=1e-5, atol=1e-5)

    print("KERNEL_OK")
</pallas_src>

<mosaic_0001>
module attributes {stable_mosaic.version = 11 : i64} {
  func.func @_iou_label_kernel(%arg0: i32, %arg1: memref<1x256xi32, #tpu.memory_space<vmem>>, %arg2: memref<1x256xi32, #tpu.memory_space<vmem>>, %arg3: memref<16x1xi32, #tpu.memory_space<vmem>>, %arg4: memref<16x1xi32, #tpu.memory_space<vmem>>, %arg5: memref<16x4xf32, #tpu.memory_space<vmem>>, %arg6: memref<16x4x256xf32, #tpu.memory_space<vmem>>, %arg7: memref<16x256xf32, #tpu.memory_space<vmem>>) attributes {dimension_semantics = [#tpu.dimension_semantics<parallel>], iteration_bounds = array<i64: 2>, scalar_prefetch = 0 : i64, scratch_operands = 0 : i64, tpu.core_type = #tpu.core_type<tc>, window_params = [{pipeline_mode = #tpu.pipeline_mode<synchronous>, transform_indices = @transform_0, window_bounds = array<i64: 1, 256>}, {pipeline_mode = #tpu.pipeline_mode<synchronous>, transform_indices = @transform_1, window_bounds = array<i64: 1, 256>}, {transform_indices = @transform_2, window_bounds = array<i64: 16, 1>}, {transform_indices = @transform_3, window_bounds = array<i64: 16, 1>}, {transform_indices = @transform_4, window_bounds = array<i64: 16, 4>}, {transform_indices = @transform_5, window_bounds = array<i64: 16, 4, 256>}, {transform_indices = @transform_6, window_bounds = array<i64: 16, 256>}]} {
    %c0 = arith.constant 0 : index
    %c0_0 = arith.constant 0 : index
    %0 = vector.load %arg1[%c0, %c0_0] : memref<1x256xi32, #tpu.memory_space<vmem>>, vector<1x256xi32>
    %c0_1 = arith.constant 0 : index
    %c0_2 = arith.constant 0 : index
    %1 = vector.load %arg2[%c0_1, %c0_2] : memref<1x256xi32, #tpu.memory_space<vmem>>, vector<1x256xi32>
    %c0_3 = arith.constant 0 : index
    %c0_4 = arith.constant 0 : index
    %2 = vector.load %arg3[%c0_3, %c0_4] : memref<16x1xi32, #tpu.memory_space<vmem>>, vector<16x1xi32>
    %c0_5 = arith.constant 0 : index
    %c0_6 = arith.constant 0 : index
    %3 = vector.load %arg4[%c0_5, %c0_6] : memref<16x1xi32, #tpu.memory_space<vmem>>, vector<16x1xi32>
    %c0_7 = arith.constant 0 : index
    %c0_8 = arith.constant 0 : index
    %4 = vector.load %arg5[%c0_7, %c0_8] : memref<16x4xf32, #tpu.memory_space<vmem>>, vector<16x4xf32>
    %5 = vector.extract_strided_slice %4 {offsets = [0, 0], sizes = [16, 1], strides = [1, 1]} : vector<16x4xf32> to vector<16x1xf32>
    %6 = vector.extract_strided_slice %4 {offsets = [0, 1], sizes = [16, 1], strides = [1, 1]} : vector<16x4xf32> to vector<16x1xf32>
    %7 = vector.extract_strided_slice %4 {offsets = [0, 2], sizes = [16, 1], strides = [1, 1]} : vector<16x4xf32> to vector<16x1xf32>
    %8 = vector.extract_strided_slice %4 {offsets = [0, 3], sizes = [16, 1], strides = [1, 1]} : vector<16x4xf32> to vector<16x1xf32>
    %c5_i32 = arith.constant 5 : i32
    %9 = vector.broadcast %c5_i32 : i32 to vector<16x1xi32>
    %10 = arith.subi %3, %9 : vector<16x1xi32>
    %c0_i32 = arith.constant 0 : i32
    %11 = vector.broadcast %c0_i32 : i32 to vector<16x1xi32>
    %12 = arith.maxsi %10, %11 : vector<16x1xi32>
    %c5_i32_9 = arith.constant 5 : i32
    %13 = vector.broadcast %c5_i32_9 : i32 to vector<16x1xi32>
    %14 = arith.addi %3, %13 : vector<16x1xi32>
    %c15_i32 = arith.constant 15 : i32
    %15 = vector.broadcast %c15_i32 : i32 to vector<16x1xi32>
    %16 = arith.minsi %14, %15 : vector<16x1xi32>
    %c5_i32_10 = arith.constant 5 : i32
    %17 = vector.broadcast %c5_i32_10 : i32 to vector<16x1xi32>
    %18 = arith.subi %2, %17 : vector<16x1xi32>
    %c0_i32_11 = arith.constant 0 : i32
    %19 = vector.broadcast %c0_i32_11 : i32 to vector<16x1xi32>
    %20 = arith.maxsi %18, %19 : vector<16x1xi32>
    %c5_i32_12 = arith.constant 5 : i32
    %21 = vector.broadcast %c5_i32_12 : i32 to vector<16x1xi32>
    %22 = arith.addi %2, %21 : vector<16x1xi32>
    %c15_i32_13 = arith.constant 15 : i32
    %23 = vector.broadcast %c15_i32_13 : i32 to vector<16x1xi32>
    %24 = arith.minsi %22, %23 : vector<16x1xi32>
    %25 = vector.broadcast %0 : vector<1x256xi32> to vector<16x256xi32>
    %26 = vector.broadcast %12 : vector<16x1xi32> to vector<16x256xi32>
    %27 = arith.cmpi sge, %25, %26 : vector<16x256xi32>
    %28 = vector.broadcast %0 : vector<1x256xi32> to vector<16x256xi32>
    %29 = vector.broadcast %16 : vector<16x1xi32> to vector<16x256xi32>
    %30 = arith.cmpi sle, %28, %29 : vector<16x256xi32>
    %31 = arith.andi %27, %30 : vector<16x256xi1>
    %32 = vector.broadcast %1 : vector<1x256xi32> to vector<16x256xi32>
    %33 = vector.broadcast %20 : vector<16x1xi32> to vector<16x256xi32>
    %34 = arith.cmpi sge, %32, %33 : vector<16x256xi32>
    %35 = arith.andi %31, %34 : vector<16x256xi1>
    %36 = vector.broadcast %1 : vector<1x256xi32> to vector<16x256xi32>
    %37 = vector.broadcast %24 : vector<16x1xi32> to vector<16x256xi32>
    %38 = arith.cmpi sle, %36, %37 : vector<16x256xi32>
    %39 = arith.andi %35, %38 : vector<16x256xi1>
    %c15_i32_14 = arith.constant 15 : i32
    %40 = vector.broadcast %c15_i32_14 : i32 to vector<1x256xi32>
    %41 = arith.cmpi eq, %0, %40 : vector<1x256xi32>
    %42 = vector.broadcast %0 : vector<1x256xi32> to vector<16x256xi32>
    %43 = vector.broadcast %3 : vector<16x1xi32> to vector<16x256xi32>
    %44 = arith.subi %42, %43 : vector<16x256xi32>
    %c5_i32_15 = arith.constant 5 : i32
    %45 = vector.shape_cast %41 : vector<1x256xi1> to vector<1x256xi1>
    %46 = vector.broadcast %45 : vector<1x256xi1> to vector<16x256xi1>
    %47 = vector.broadcast %c5_i32_15 : i32 to vector<16x256xi32>
    %48 = arith.select %46, %47, %44 : vector<16x256xi1>, vector<16x256xi32>
    %49 = arith.sitofp %48 : vector<16x256xi32> to vector<16x256xf32>
    %c15_i32_16 = arith.constant 15 : i32
    %50 = vector.broadcast %c15_i32_16 : i32 to vector<1x256xi32>
    %51 = arith.cmpi eq, %1, %50 : vector<1x256xi32>
    %52 = vector.broadcast %1 : vector<1x256xi32> to vector<16x256xi32>
    %53 = vector.broadcast %2 : vector<16x1xi32> to vector<16x256xi32>
    %54 = arith.subi %52, %53 : vector<16x256xi32>
    %c5_i32_17 = arith.constant 5 : i32
    %55 = vector.shape_cast %51 : vector<1x256xi1> to vector<1x256xi1>
    %56 = vector.broadcast %55 : vector<1x256xi1> to vector<16x256xi1>
    %57 = vector.broadcast %c5_i32_17 : i32 to vector<16x256xi32>
    %58 = arith.select %56, %57, %54 : vector<16x256xi1>, vector<16x256xi32>
    %59 = arith.sitofp %58 : vector<16x256xi32> to vector<16x256xf32>
    %60 = vector.broadcast %5 : vector<16x1xf32> to vector<16x256xf32>
    %61 = arith.addf %60, %59 : vector<16x256xf32>
    %62 = vector.broadcast %6 : vector<16x1xf32> to vector<16x256xf32>
    %63 = arith.subf %62, %59 : vector<16x256xf32>
    %64 = vector.broadcast %7 : vector<16x1xf32> to vector<16x256xf32>
    %65 = arith.addf %64, %49 : vector<16x256xf32>
    %66 = vector.broadcast %8 : vector<16x1xf32> to vector<16x256xf32>
    %67 = arith.subf %66, %49 : vector<16x256xf32>
    %c0_18 = arith.constant 0 : index
    %c0_19 = arith.constant 0 : index
    %c0_20 = arith.constant 0 : index
    %68 = vector.load %arg6[%c0_18, %c0_19, %c0_20] : memref<16x4x256xf32, #tpu.memory_space<vmem>>, vector<16x1x256xf32>
    %69 = vector.shape_cast %68 : vector<16x1x256xf32> to vector<16x256xf32>
    %c0_21 = arith.constant 0 : index
    %c1 = arith.constant 1 : index
    %c0_22 = arith.constant 0 : index
    %70 = vector.load %arg6[%c0_21, %c1, %c0_22] : memref<16x4x256xf32, #tpu.memory_space<vmem>>, vector<16x1x256xf32>
    %71 = vector.shape_cast %70 : vector<16x1x256xf32> to vector<16x256xf32>
    %c0_23 = arith.constant 0 : index
    %c2 = arith.constant 2 : index
    %c0_24 = arith.constant 0 : index
    %72 = vector.load %arg6[%c0_23, %c2, %c0_24] : memref<16x4x256xf32, #tpu.memory_space<vmem>>, vector<16x1x256xf32>
    %73 = vector.shape_cast %72 : vector<16x1x256xf32> to vector<16x256xf32>
    %c0_25 = arith.constant 0 : index
    %c3 = arith.constant 3 : index
    %c0_26 = arith.constant 0 : index
    %74 = vector.load %arg6[%c0_25, %c3, %c0_26] : memref<16x4x256xf32, #tpu.memory_space<vmem>>, vector<16x1x256xf32>
    %75 = vector.shape_cast %74 : vector<16x1x256xf32> to vector<16x256xf32>
    %76 = arith.addf %61, %63 : vector<16x256xf32>
    %77 = arith.addf %65, %67 : vector<16x256xf32>
    %78 = arith.mulf %76, %77 : vector<16x256xf32>
    %79 = arith.addf %69, %71 : vector<16x256xf32>
    %80 = arith.addf %73, %75 : vector<16x256xf32>
    %81 = arith.mulf %79, %80 : vector<16x256xf32>
    %82 = arith.minimumf %69, %61 : vector<16x256xf32>
    %83 = arith.minimumf %71, %63 : vector<16x256xf32>
    %84 = arith.addf %82, %83 : vector<16x256xf32>
    %85 = arith.minimumf %75, %67 : vector<16x256xf32>
    %86 = arith.minimumf %73, %65 : vector<16x256xf32>
    %87 = arith.addf %85, %86 : vector<16x256xf32>
    %88 = arith.mulf %84, %87 : vector<16x256xf32>
    %89 = arith.addf %78, %81 : vector<16x256xf32>
    %90 = arith.subf %89, %88 : vector<16x256xf32>
    %cst = arith.constant 1.000000e+00 : f32
    %91 = vector.broadcast %cst : f32 to vector<16x256xf32>
    %92 = arith.addf %88, %91 : vector<16x256xf32>
    %cst_27 = arith.constant 1.000000e+00 : f32
    %93 = vector.broadcast %cst_27 : f32 to vector<16x256xf32>
    %94 = arith.addf %90, %93 : vector<16x256xf32>
    %95 = tpu.reciprocal %94 : vector<16x256xf32> -> vector<16x256xf32>
    %96 = arith.mulf %92, %95 : vector<16x256xf32>
    %cst_28 = arith.constant -1.000000e+00 : f32
    %97 = vector.broadcast %cst_28 : f32 to vector<16x256xf32>
    %98 = arith.select %39, %96, %97 : vector<16x256xi1>, vector<16x256xf32>
    %c0_29 = arith.constant 0 : index
    %c0_30 = arith.constant 0 : index
    %99 = vector.load %arg7[%c0_29, %c0_30] : memref<16x256xf32, #tpu.memory_space<vmem>>, vector<16x256xf32>
    tpu.vector_store %arg7[%c0_29, %c0_30], %98 {strides = array<i32>} : memref<16x256xf32, #tpu.memory_space<vmem>>, vector<16x256xf32>,
    return
  }
  func.func @transform_0(%arg0: i32) -> (i32, i32) {
    %c0_i32 = arith.constant 0 : i32
    %c0_i32_0 = arith.constant 0 : i32
    %c0_i32_1 = arith.constant 0 : i32
    return %c0_i32, %c0_i32_0 : i32, i32
  }
  func.func @transform_1(%arg0: i32) -> (i32, i32) {
    %c0_i32 = arith.constant 0 : i32
    %c0_i32_0 = arith.constant 0 : i32
    %c0_i32_1 = arith.constant 0 : i32
    return %c0_i32, %c0_i32_0 : i32, i32
  }
  func.func @transform_2(%arg0: i32) -> (i32, i32) {
    %c0_i32 = arith.constant 0 : i32
    %c0_i32_0 = arith.constant 0 : i32
    return %arg0, %c0_i32 : i32, i32
  }
  func.func @transform_3(%arg0: i32) -> (i32, i32) {
    %c0_i32 = arith.constant 0 : i32
    %c0_i32_0 = arith.constant 0 : i32
    return %arg0, %c0_i32 : i32, i32
  }
  func.func @transform_4(%arg0: i32) -> (i32, i32) {
    %c0_i32 = arith.constant 0 : i32
    %c0_i32_0 = arith.constant 0 : i32
    return %arg0, %c0_i32 : i32, i32
  }
  func.func @transform_5(%arg0: i32) -> (i32, i32, i32) {
    %c0_i32 = arith.constant 0 : i32
    %c0_i32_0 = arith.constant 0 : i32
    %c0_i32_1 = arith.constant 0 : i32
    return %arg0, %c0_i32, %c0_i32_0 : i32, i32, i32
  }
  func.func @transform_6(%arg0: i32) -> (i32, i32) {
    %c0_i32 = arith.constant 0 : i32
    %c0_i32_0 = arith.constant 0 : i32
    return %arg0, %c0_i32 : i32, i32
  }
}

</mosaic_0001>

<bundles_post_ra>
// kernel: tpu_custom_call.1
= control target key start
LH: loop header
LB: loop body
LE: loop exit
PB: predicated region body
PF: predicated region fallthrough
CT: control target
= control target key end

     0   :  { %11 = vsyncpa [#allocation3], 0  ;;  %s3572_s0 = inlined_call_operand.vmem [shape: s32[1,256], index: 0, kind: input, shape index: {}]   ;;  %s3573_s1 = inlined_call_operand.vmem [shape: s32[1,256], index: 1, kind: input, shape index: {}]   ;;  %s3574_s2 = inlined_call_operand.vmem [shape: s32[32,1], index: 2, kind: input, shape index: {}]   ;;  %s3575_s3 = inlined_call_operand.vmem [shape: s32[32,1], index: 3, kind: input, shape index: {}]   ;;  %s3576_s4 = inlined_call_operand.vmem [shape: f32[32,4], index: 4, kind: input, shape index: {}]   ;;  %s3577_s5 = inlined_call_operand.hbm [shape: f32[32,4,256], index: 5, kind: input, shape index: {}]   ;;  %s3578_s6 = inlined_call_operand.hbm [shape: f32[32,256], index: 6, kind: output, shape index: {}]  }
   0x1   :  { %13 = vsyncpa [#allocation3 + $0x1], 0 }
   0x2   :  { %14 = vsyncpa [#allocation4], 0 }
   0x3   :  { %16 = vsyncpa [#allocation4 + $0x1], 0  ;;  %s2394_s21 = smov 0   ;;  %s2396_s22 = smov 0  }
   0x4   :  { %s2398_s23 = smov 0   ;;  %s2400_s24 = smov 0  }
   0x5 LB: > { %s2415_s25 = sadd.s32 4294967295, %s2346_s24   ;;  %s2084_s26 = sadd.s32 4294967294, %s2346_s24   ;;  %s2346_s24 = sphi %s2400_s24, %s3848_s24   ;;  %s2342_s23 = sphi %s2398_s23, %s3847_s23   ;;  %s2338_s22 = sphi %s2396_s22, %s3846_s22   ;;  %s2334_s21 = sphi %s2394_s21, %s3845_s21  }
   0x6   : > { %s2419_s27 = sadd.s32 1, %s2346_s24   ;;  %s149_s28 = sadd.s32 1, %s2342_s23 }
   0x7   : > { %s146_s29 = ssub.s32 %s2346_s24, %s2419_s27  ;;  %p156_p0 = scmp.ne.s32.totalorder %s2342_s23, %s2338_s22 }
   0x8   : > { %p147_p1 = scmp.eq.s32.totalorder %s146_s29, 0  ;;  %p157_p2 = scmp.eq.s32.totalorder %s2346_s24, 0 }
   0x9   : > { %p162_p3 = scmp.ne.s32.totalorder %s2338_s22, %s2334_s21  ;;  %p163_p4 = scmp.eq.s32.totalorder %s2415_s25, 0 }
   0xa   : > { %s2431_s30 = scalar_select %p147_p1, %s2342_s23, %s149_s28  }
   0xb   : > { %p2433_p5 = por %p157_p2, %p156_p0  ;;  %p2437_p6 = por %p163_p4, %p162_p3 }
   0xc   : > { %p186_p7 = scmp.eq.s32.totalorder %s2415_s25, 1  ;;  %p192_p8 = scmp.eq.s32.totalorder %s2084_s26, 1 }
   0xd   : > { %p2189_p10 = scmp.lt.s32.totalorder %s2346_s24, 2  ;;  %s245_s11 = sand.u32 1, %s2342_s23  }
   0xe   : > { %p2444_p11 = por %p186_p7, %p156_p0  ;;  %p2448_p12 = por %p192_p8, %p162_p3 }
   0xf   : > { %s2174_s12 = sshll.u32 %s2346_s24, 11  ;;  %s2087_s13 = sshll.u32 %s245_s11, 7 }
  0x10   : > { %s3652_s9 = scalar_select %p2444_p11, 1, 0 }
  0x11   : > { %s3653_s10 = scalar_select %p2448_p12, 1, 0 }
  0x12   : > { %s2457_s16 = scalar_lea.hbm %s3577_s5, %s2174_s12  ;;  %s249_s17 = scalar_lea.vmem [#allocation2], %s2087_s13 }
  0x13   : > { %s257_s18 = sshll.u32 %s249_s17, 4  ;;  %p2461_p13 = pnand %p2189_p10, %p2433_p5  ;;  %s2465_s18 = int_to_ptr.vmem [resolvable:$true] %s257_s18 }
  0x14   : > { %s2467_s20 = scalar_lea.sflag [#allocation3], %s245_s11  ;;  %s2250_s26 = scalar_lea.hbm %s2457_s16, 2048 }
  0x15   : > { %p2251_p0 = scmp.ne.s32.totalorder %s2457_s16, %s2250_s26  ;;  %p2252_p1 = pneg %p2461_p13 }
  0x16   : > { %s2255_s7 = scalar_lea.hbm %s3577_s5, 4096  ;;  %p2256_p4 = scmp.lt.u32.totalorder %s2457_s16, %s3577_s5 }
  0x17   : > { %p2253_p2 = pnand %p2252_p1, %p2251_p0  ;;  %p2257_p5 = scmp.lt.u32.totalorder %s2255_s7, %s2250_s26 }
  0x18   : > { %p2259_p8 = scmp.lt.u32.totalorder %s2250_s26, %s2457_s16 }
  0x19   : > { %p2254_p3 = pneg %p2253_p2  ;;  %p2258_p7 = por %p2257_p5, %p2256_p4 }
  0x1b   : > { %p2260_p10 = por %p2259_p8, %p2258_p7 }
  0x1d   : > { %p2261_p9 = pnand %p2260_p10, %p2254_p3 }
  0x1f   : > { %2264 = shalt.err (!%p2261_p9)
}
  0x20   : > { %s2265_s11 = scalar_lea.vmem %s2465_s18, 2048  ;;  %s2348_s14 = smov [#allocation2]  }
  0x21   : > { %p2266_p0 = scmp.ne.s32.totalorder %s2465_s18, %s2265_s11  ;;  %s2270_s15 = sshll.u32 %s2348_s14, 4  ;;  %s2271_s15 = int_to_ptr.vmem [resolvable:$false] %s2270_s15 }
  0x22   : > { %s2272_s17 = scalar_lea.vmem %s2271_s15, 4096  ;;  %p2273_p11 = scmp.lt.s32.totalorder %s2465_s18, %s2271_s15 }
  0x23   : > { %p2268_p2 = pnand %p2266_p0, %p2252_p1  ;;  %p2274_p4 = scmp.lt.s32.totalorder %s2272_s17, %s2265_s11 }
  0x25   : > { %p2269_p12 = pneg %p2268_p2  ;;  %p2275_p5 = por %p2274_p4, %p2273_p11 }
  0x27   : > { %p2276_p7 = pnand %p2275_p5, %p2269_p12 }
  0x29   : > { %2279 = shalt.err (!%p2276_p7)
}
  0x2a   : > { %s2349_s26 = smov 128   ;;  %s2350_s28 = smov 8  }
  0x2b   : > { %2184 = dma.hbm_to_vmem [thread:$0]  (!%p2461_p13), %s2457_s16, 2048, %s2465_s18, %s2467_s20, %s2349_s26, %s2349_s26, %s2350_s28  }
  0x2c   : > { %p2091_p9 = scmp.ge.s32.totalorder %s2346_s24, 1  ;;  %p265_p1 = scmp.lt.s32.totalorder %s2346_s24, 3 }
  0x2e   : > { %p266_p3 = pnand %p2091_p9, %p265_p1 }
  0x30   : > { %269 = sbr.rel (%p266_p3) target bundleno = 342 (0x156), region = 44 }
  0x37   : > { %s2498_s29 = sand.u32 1, %s2338_s22  }
  0x38   : > { %s2092_s7 = sshll.u32 %s2498_s29, 7  ;;  %s272_s12 = scalar_lea.sflag [#allocation3], %s2498_s29 }
  0x39   : > { %s2502_s13 = scalar_lea.vmem [#allocation2], %s2092_s7 }
  0x3a   : > { %2325 = dma.done.wait (%p2437_p6), %s272_s12, 2048  }
  0x3b   : > { %2327 = vsyncadd (%p2437_p6), %s272_s12, 4294965248  ;;  %s2094_s16 = sshll.u32 %s2415_s25, 1  ;;  %v2351_v0 = vmov 0   ;;  %v2352_v7 = vmov 1   ;;  %v2353_v9 = vmov 2   ;;  %v2354_v13 = vmov 3  }
  0x3c   : > { %2233 = vset.pattern.permute.xlu1 %v2351_v0  ;;  %2232 = vset.pattern.permute.xlu0 %v2351_v0  ;;  %p320_p11 = scmp.lt.s32.totalorder %s2094_s16, 3  ;;  %v371_v26 = vlaneseq  ;;  %v2525_v27 = vld [vmem:[%s3572_s0] sm:$0x3]  ;;  %v2355_v34 = vmov 1966171168   ;;  %p3842_p12 = scmp.ne.s32.totalorder %s3652_s9, 0 }
  0x3d   : > { %v2530_v28 = vld [vmem:[%s3573_s1] sm:$0x3]  ;;  %vm439_vm8 = vcmp.eq.s32.totalorder %v2525_v27, 15  ;;  %v2548_v35 = vunpack.c.l.s4 %v2355_v34  ;;  %v2554_v37 = vld [vmem:[%s2502_s13 + $0x8] ss:$4 sm:$0x3] }
  0x3e   : > { %s3850_s16 = smov (!%p320_p11, %s2094_s16), 3  ;;  %v2532_v29 = vshrl.u32 %v371_v26, 7  ;;  %vm469_vm9 = vcmp.eq.s32.totalorder %v2530_v28, 15  ;;  %v2543_v32 = vsel %vm439_vm8, 1, %v2351_v0  ;;  %s2356_s26 = smov [#allocation5]  }
  0x3f   : > { %s2095_s18 = sshll.u32 %s3850_s16, 3  ;;  %v2546_v33 = vsel %vm469_vm9, 1, %v2351_v0  ;;  %v2551_v36 = vld [vmem:[%s2502_s13] ss:$4 sm:$0x3] }
  0x40   : > { %s329_s11 = scalar_lea.vmem %s3575_s3, %s2095_s18  ;;  %s323_s17 = scalar_lea.vmem %s3574_s2, %s2095_s18  ;;  %v2537_v30 = vsub.s32 0, %v2532_v29  ;;  %v2540_v31 = vsub.s32 1, %v2532_v29  ;;  %v2557_v38 = vld [vmem:[%s2502_s13 + $0x10] ss:$4 sm:$0x3] }
  0x41   : > { %v343_v1 = vld [vmem:[%s329_s11] sm:$0xff]  ;;  %v344_v3 = vld [vmem:[%s329_s11 + $0x8] sm:$0xff]  ;;  %s335_s28 = scalar_lea.vmem %s3576_s4, %s2095_s18  ;;  %v2560_v39 = vld [vmem:[%s2502_s13 + $0x18] ss:$4 sm:$0x3]  ;;  %s2176_s11 = sshll.u32 %s2415_s25, 9 }
  0x42   : > { %v341_v2 = vld [vmem:[%s323_s17] sm:$0xff]  ;;  %441 = vperm.xlu0 %2232, %v343_v1   ;;  %v342_v4 = vld [vmem:[%s323_s17 + $0x8] sm:$0xff]  ;;  %v2100_v8 = vadd.s32 4294967291, %v343_v1  ;;  %v354_v10 = vadd.s32 5, %v344_v3  ;;  %v2101_v14 = vadd.s32 4294967291, %v344_v3  ;;  %v353_v17 = vadd.s32 5, %v343_v1  ;;  %s3526_s15 = scalar_lea.hbm %s3578_s6, %s2176_s11 }
  0x43   : > { %471 = vperm.xlu1 %2233, %v341_v2   ;;  %v345_v5 = vld [vmem:[%s335_s28] sm:$0xff]  ;;  %v346_v6 = vld [vmem:[%s335_s28 + $0x8] sm:$0xff]  ;;  %v2103_v12 = vadd.s32 4294967291, %v342_v4  ;;  %v366_v16 = vadd.s32 5, %v342_v4  ;;  %v2102_v20 = vadd.s32 4294967291, %v341_v2  ;;  %v365_v23 = vadd.s32 5, %v341_v2 }
  0x44   : > { %vm349_vm0 = vcmp.gt.s32.totalorder %v2100_v8, 0  ;;  %vm357_vm1 = vcmp.lt.s32.totalorder %v354_v10, 15  ;;  %vm351_vm3 = vcmp.gt.s32.totalorder %v2101_v14, 0  ;;  %vm355_vm5 = vcmp.lt.s32.totalorder %v353_v17, 15  ;;  %s1961_s17 = scalar_lea.sflag [#allocation4], %s2498_s29  ;;  %s2284_s28 = sshll.u32 %s2356_s26, 4  ;;  %s2285_s28 = int_to_ptr.vmem [resolvable:$false] %s2284_s28 }
  0x45   : > { %v350_v11 = vsel %vm349_vm0, %v2100_v8, 0  ;;  %v358_v15 = vsel %vm357_vm1, %v354_v10, 15  ;;  %vm363_vm2 = vcmp.gt.s32.totalorder %v2103_v12, 0  ;;  %v352_v19 = vsel %vm351_vm3, %v2101_v14, 0  ;;  %s2286_s7 = scalar_lea.vmem %s2285_s28, 1024 }
  0x46   : > { %444 = vperm.xlu0 %2232, %v344_v3   ;;  %v364_v18 = vsel %vm363_vm2, %v2103_v12, 0  ;;  %vm369_vm4 = vcmp.lt.s32.totalorder %v366_v16, 15  ;;  %v356_v22 = vsel %vm355_vm5, %v353_v17, 15  ;;  %vm361_vm6 = vcmp.gt.s32.totalorder %v2102_v20, 0 }
  0x47   : > { %474 = vperm.xlu1 %2233, %v342_v4   ;;  %v370_v21 = vsel %vm369_vm4, %v366_v16, 15  ;;  %v362_v24 = vsel %vm361_vm6, %v2102_v20, 0  ;;  %vm367_vm7 = vcmp.lt.s32.totalorder %v365_v23, 15  ;;  %v2563_v40 = vld [vmem:[%s2502_s13 + $0x1] ss:$4 sm:$0x3] }
  0x48   : > { %v368_v25 = vsel %vm367_vm7, %v365_v23, 15  ;;  %3655 = vst [vmem:[#allocation8_spill] sm:$0xff] %v2563_v40  ;;  %v2566_v41 = vld [vmem:[%s2502_s13 + $0x9] ss:$4 sm:$0x3]  ;;  %v688_v3 = vadd.f32 %v2563_v40, %v2551_v36 }
  0x49   : > { %3656 = vst [vmem:[#allocation9_spill] sm:$0xff] %v2566_v41  ;;  %v2569_v42 = vld [vmem:[%s2502_s13 + $0x11] ss:$4 sm:$0x3]  ;;  %v689_v4 = vadd.f32 %v2566_v41, %v2554_v37 }
  0x4a   : > { %501 = vperm.xlu0 %2232, %v345_v5   ;;  %3657 = vst [vmem:[#allocation10_spill] sm:$0xff] %v2569_v42  ;;  %v2572_v43 = vld [vmem:[%s2502_s13 + $0x19] ss:$4 sm:$0x3] }
  0x4b   : > { %506 = vperm.xlu1 %2233, %v346_v6   ;;  %3658 = vst [vmem:[#allocation11_spill] sm:$0xff] %v2572_v43  ;;  %v2575_v44 = vld [vmem:[%s2502_s13 + $0x20] ss:$4 sm:$0x3] }
  0x4c   : > { %v2578_v45 = vld [vmem:[%s2502_s13 + $0x28] ss:$4 sm:$0x3]  ;;  %v2581_v46 = vld [vmem:[%s2502_s13 + $0x30] ss:$4 sm:$0x3] }
  0x4d   : > { %v2584_v47 = vld [vmem:[%s2502_s13 + $0x38] ss:$4 sm:$0x3]  ;;  %v2587_v48 = vld [vmem:[%s2502_s13 + $0x21] ss:$4 sm:$0x3] }
  0x4e   : > { %2234 = vset.pattern.permute.xlu0 %v2352_v7  ;;  %3659 = vst [vmem:[#allocation12_spill] sm:$0xff] %v2587_v48  ;;  %v2590_v49 = vld [vmem:[%s2502_s13 + $0x29] ss:$4 sm:$0x3] }
  0x4f   : > { %2235 = vset.pattern.permute.xlu1 %v2352_v7  ;;  %514 = vperm.xlu0 %2234, %v345_v5   ;;  %3660 = vst [vmem:[#allocation13_spill] sm:$0xff] %v2590_v49  ;;  %v2593_v50 = vld [vmem:[%s2502_s13 + $0x31] ss:$4 sm:$0x3]  ;;  %v693_v10 = vadd.f32 %v2590_v49, %v2578_v45 }
  0x50   : > { %518 = vperm.xlu1 %2235, %v346_v6   ;;  %3661 = vst [vmem:[#allocation14_spill] sm:$0xff] %v2593_v50  ;;  %v2596_v51 = vld [vmem:[%s2502_s13 + $0x39] ss:$4 sm:$0x3] }
  0x51   : > { %3662 = vst [vmem:[#allocation15_spill] sm:$0xff] %v2596_v51  ;;  %v2599_v52 = vld [vmem:[%s2502_s13 + $0x2] ss:$4 sm:$0x3]  ;;  %v695_v12 = vadd.f32 %v2596_v51, %v2584_v47 }
  0x52   : > { %3663 = vst [vmem:[#allocation16_spill] sm:$0xff] %v2599_v52  ;;  %v2602_v53 = vld [vmem:[%s2502_s13 + $0xa] ss:$4 sm:$0x3] }
  0x53   : > { %2237 = vset.pattern.permute.xlu0 %v2353_v9  ;;  %3664 = vst [vmem:[#allocation17_spill] sm:$0xff] %v2602_v53  ;;  %v2605_v54 = vld [vmem:[%s2502_s13 + $0x12] ss:$4 sm:$0x3] }
  0x54   : > { %2236 = vset.pattern.permute.xlu1 %v2353_v9  ;;  %530 = vperm.xlu0 %2237, %v346_v6   ;;  %3665 = vst [vmem:[#allocation18_spill] sm:$0xff] %v2605_v54  ;;  %v2608_v55 = vld [vmem:[%s2502_s13 + $0x1a] ss:$4 sm:$0x3]  ;;  %v692_v9 = vadd.f32 %v2587_v48, %v2575_v44 }
  0x55   : > { %526 = vperm.xlu1 %2236, %v345_v5   ;;  %3666 = vst [vmem:[#allocation19_spill] sm:$0xff] %v2608_v55  ;;  %v2611_v56 = vld [vmem:[%s2502_s13 + $0x3] ss:$4 sm:$0x3] }
  0x56   : > { %3667 = vst [vmem:[#allocation20_spill] sm:$0xff] %v2611_v56  ;;  %v2614_v57 = vld [vmem:[%s2502_s13 + $0xb] ss:$4 sm:$0x3] }
  0x57   : > { %3668 = vst [vmem:[#allocation21_spill] sm:$0xff] %v2614_v57  ;;  %v2617_v58 = vld [vmem:[%s2502_s13 + $0x22] ss:$4 sm:$0x3]  ;;  %v705_v14 = vadd.f32 %v2614_v57, %v2602_v53 }
  0x58   : > { %2239 = vset.pattern.permute.xlu0 %v2351_v0  ;;  %3669 = vst [vmem:[#allocation22_spill] sm:$0xff] %v2617_v58  ;;  %v2620_v59 = vld [vmem:[%s2502_s13 + $0x2a] ss:$4 sm:$0x3] }
  0x59   : > { %2238 = vset.pattern.permute.xlu1 %v2354_v13  ;;  %380 = vperm.xlu0 %2239, %v350_v11   ;;  %3670 = vst [vmem:[#allocation23_spill] sm:$0xff] %v2620_v59  ;;  %v2623_v60 = vld [vmem:[%s2502_s13 + $0x32] ss:$4 sm:$0x3]  ;;  %v694_v11 = vadd.f32 %v2593_v50, %v2581_v46 }
  0x5a   : > { %538 = vperm.xlu1 %2238, %v345_v5   ;;  %3671 = vst [vmem:[#allocation24_spill] sm:$0xff] %v2623_v60  ;;  %v2626_v61 = vld [vmem:[%s2502_s13 + $0x3a] ss:$4 sm:$0x3]  ;;  %v690_v5 = vadd.f32 %v2569_v42, %v2557_v38 }
  0x5b   : > { %3672 = vst [vmem:[#allocation25_spill] sm:$0xff] %v2626_v61  ;;  %v2629_v62 = vld [vmem:[%s2502_s13 + $0x13] ss:$4 sm:$0x3] }
  0x5c   : > { %3673 = vst [vmem:[#allocation26_spill] sm:$0xff] %v2629_v62  ;;  %v2632_v63 = vld [vmem:[%s2502_s13 + $0x1b] ss:$4 sm:$0x3] }
  0x5d   : > { %393 = vperm.xlu0 %2239, %v358_v15   ;;  %3674 = vst [vmem:[#allocation27_spill] sm:$0xff] %v2632_v63  ;;  %v2636_v1 = vld [vmem:[%s2502_s13 + $0x23] ss:$4 sm:$0x3]  ;;  %v706_v15 = vadd.f32 %v2629_v62, %v2605_v54  ;;  %v707_v16 = vadd.f32 %v2632_v63, %v2608_v55 }
  0x5e   : > { %542 = vperm.xlu1 %2238, %v346_v6   ;;  %3675 = vst [vmem:[#allocation28_spill] sm:$0xff] %v2636_v1  ;;  %v2639_v2 = vld [vmem:[%s2502_s13 + $0x2b] ss:$4 sm:$0x3]  ;;  %v691_v6 = vadd.f32 %v2572_v43, %v2560_v39 }
  0x5f   : > { %3676 = vst [vmem:[#allocation29_spill] sm:$0xff] %v2639_v2  ;;  %v2650_v7 = vld [vmem:[%s2502_s13 + $0x33] ss:$4 sm:$0x3] }
  0x60   : > { %3677 = vst [vmem:[#allocation30_spill] sm:$0xff] %v2650_v7  ;;  %v2653_v8 = vld [vmem:[%s2502_s13 + $0x3b] ss:$4 sm:$0x3]  ;;  %v710_v26 = vadd.f32 %v2650_v7, %v2623_v60 }
  0x61   : > { %415 = vperm.xlu0 %2239, %v364_v18   ;;  %3678 = vst [vmem:[#allocation31_spill] sm:$0xff] %v2653_v8  ;;  %v2672_v17 = vld [vmem:[%s2502_s13 + $0x48] ss:$4 sm:$0x3]  ;;  %v711_v34 = vadd.f32 %v2653_v8, %v2626_v61 }
  0x62   : > { %2240 = vset.pattern.permute.xlu1 %v2351_v0  ;;  %v744_v0 = vunpack.c.0.s8 %v2548_v35  ;;  %v2675_v18 = vld [vmem:[%s2502_s13 + $0x50] ss:$4 sm:$0x3]  ;;  %v2681_v20 = vld [vmem:[%s2502_s13 + $0x41] ss:$4 sm:$0x3] }
  0x63   : > { %383 = vperm.xlu1 %2240, %v352_v19   ;;  %v2678_v19 = vld [vmem:[%s2502_s13 + $0x58] ss:$4 sm:$0x3]  ;;  %3679 = vst [vmem:[#allocation32_spill] sm:$0xff] %v2681_v20 }
  0x64   : > { %v2690_v23 = vld [vmem:[%s2502_s13 + $0x59] ss:$4 sm:$0x3]  ;;  %v2701_v35 = vld [vmem:[%s2502_s13 + $0x68] ss:$4 sm:$0x3]  ;;  %v2722_v8 = vsub.s32 %v744_v0, %v2532_v29  ;;  %v723_v29 = vmul.f32 %v707_v16, %v691_v6 }
  0x65   : > { %429 = vperm.xlu0 %2239, %v370_v21   ;;  %v2684_v21 = vld [vmem:[%s2502_s13 + $0x49] ss:$4 sm:$0x3]  ;;  %3682 = vst [vmem:[#allocation35_spill] sm:$0xff] %v2690_v23 }
  0x66   : > { %3680 = vst [vmem:[#allocation33_spill] sm:$0xff] %v2684_v21  ;;  %v2704_v63 = vld [vmem:[%s2502_s13 + $0x70] ss:$4 sm:$0x3] }
  0x67   : > { %390 = vperm.xlu1 %2240, %v356_v22   ;;  %v2687_v22 = vld [vmem:[%s2502_s13 + $0x51] ss:$4 sm:$0x3]  ;;  %v2707_v62 = vld [vmem:[%s2502_s13 + $0x78] ss:$4 sm:$0x3] }
  0x68   : > { %3681 = vst [vmem:[#allocation34_spill] sm:$0xff] %v2687_v22  ;;  %3683 = vst [vmem:[#allocation36_spill] sm:$0xff] %v2707_v62  ;;  %v2710_v57 = vld [vmem:[%s2502_s13 + $0x61] ss:$4 sm:$0x3]  ;;  %v698_v16 = vadd.f32 %v2687_v22, %v2675_v18 }
  0x69   : > { %2241 = vset.pattern.permute.xlu0 %v2354_v13  ;;  %v704_v13 = vadd.f32 %v2611_v56, %v2599_v52  ;;  %3684 = vst [vmem:[#allocation37_spill] sm:$0xff] %v2710_v57  ;;  %v2719_v7 = vld [vmem:[%s2502_s13 + $0x79] ss:$4 sm:$0x3]  ;;  %v722_v52 = vmul.f32 %v706_v15, %v690_v5  ;;  %v727_v5 = vmul.f32 %v711_v34, %v695_v12 }
  0x6a   : > { %3687 = vst [vmem:[#allocation40_spill] sm:$0xff] %v2719_v7  ;;  %v2725_v56 = vld [vmem:[%s2502_s13 + $0x40] ss:$4 sm:$0x3]  ;;  %v697_v15 = vadd.f32 %v2684_v21, %v2672_v17 }
  0x6b   : > { %412 = vperm.xlu1 %2240, %v362_v24   ;;  %v708_v24 = vadd.f32 %v2636_v1, %v2617_v58  ;;  %v2713_v1 = vld [vmem:[%s2502_s13 + $0x69] ss:$4 sm:$0x3]  ;;  %v2728_v61 = vld [vmem:[%s2502_s13 + $0x42] ss:$4 sm:$0x3]  ;;  %v720_v53 = vmul.f32 %v704_v13, %v688_v3  ;;  %v721_v58 = vmul.f32 %v705_v14, %v689_v4  ;;  %v726_v4 = vmul.f32 %v710_v26, %v694_v11 }
  0x6c   : > { %3685 = vst [vmem:[#allocation38_spill] sm:$0xff] %v2713_v1  ;;  %v2731_v60 = vld [vmem:[%s2502_s13 + $0x4a] ss:$4 sm:$0x3]  ;;  %v696_v14 = vadd.f32 %v2681_v20, %v2725_v56  ;;  %v703_v26 = vadd.f32 %v2719_v7, %v2707_v62  ;;  %v1345_v20 = vcombine.low %v722_v52, %v723_v29  ;;  %v484_v52 = vrot.slane %v2546_v33, %v2537_v30 }
  0x6d   : > { %v2734_v55 = vld [vmem:[%s2502_s13 + $0x52] ss:$4 sm:$0x3]  ;;  %v2737_v54 = vld [vmem:[%s2502_s13 + $0x5a] ss:$4 sm:$0x3]  ;;  %v724_v41 = vmul.f32 %v708_v24, %v692_v9  ;;  %v699_v9 = vadd.f32 %v2690_v23, %v2678_v19  ;;  %v701_v24 = vadd.f32 %v2713_v1, %v2701_v35  ;;  %v1347_v7 = vcombine.low %v726_v4, %v727_v5 }
  0x6e   : > { %3688 = vst [vmem:[#allocation41_spill] sm:$0xff] %v2737_v54  ;;  %v2743_v0 = vld [vmem:[%s2502_s13 + $0x43] ss:$4 sm:$0x3]  ;;  %vm2832_vm10 = vcmp.eq.s32.totalorder %v484_v52, 1 }
  0x6f   : > { %426 = vperm.xlu1 %2240, %v368_v25   ;;  %v709_v25 = vadd.f32 %v2639_v2, %v2620_v59  ;;  %v2716_v2 = vld [vmem:[%s2502_s13 + $0x71] ss:$4 sm:$0x3]  ;;  %v2740_v59 = vld [vmem:[%s2502_s13 + $0x60] ss:$4 sm:$0x3]  ;;  %v712_v23 = vadd.f32 %v2743_v0, %v2728_v61 }
  0x70   : > { %3686 = vst [vmem:[#allocation39_spill] sm:$0xff] %v2716_v2  ;;  %3689 = vst [vmem:[#allocation42_spill] sm:$0xff] %v2743_v0  ;;  %v2746_v51 = vld [vmem:[%s2502_s13 + $0x4b] ss:$4 sm:$0x3]  ;;  %v700_v12 = vadd.f32 %v2710_v57, %v2740_v59 }
  0x71   : > { %3690 = vst [vmem:[#allocation43_spill] sm:$0xff] %v2746_v51  ;;  %v2749_v43 = vld [vmem:[%s2502_s13 + $0x62] ss:$4 sm:$0x3]  ;;  %v725_v3 = vmul.f32 %v709_v25, %v693_v10  ;;  %v702_v25 = vadd.f32 %v2716_v2, %v2704_v63  ;;  %v713_v21 = vadd.f32 %v2746_v51, %v2731_v60  ;;  %v1344_v2 = vcombine.low %v720_v53, %v721_v58 }
  0x72   : > { %v2752_v50 = vld [vmem:[%s2502_s13 + $0x6a] ss:$4 sm:$0x3]  ;;  %v2755_v49 = vld [vmem:[%s2502_s13 + $0x72] ss:$4 sm:$0x3]  ;;  %v488_v53 = vrot.slane %v2546_v33, %v2540_v31  ;;  %v728_v58 = vmul.f32 %v712_v23, %v696_v14  ;;  %v458_v33 = vrot.slane %v2543_v32, %v2540_v31 }
  0x73   : > { %3691 = vst [vmem:[#allocation44_spill] sm:$0xff] %v2755_v49  ;;  %v2758_v42 = vld [vmem:[%s2502_s13 + $0x7a] ss:$4 sm:$0x3]  ;;  %v1346_v48 = vcombine.low %v724_v41, %v725_v3  ;;  %v2816_v41 = vrot.slane %v2530_v28, %v2540_v31  ;;  %v729_v29 = vmul.f32 %v713_v21, %v697_v15  ;;  %v1354_v5 = vrot.slane %v1344_v2, %v2722_v8 }
  0x74   : > { %3692 = vst [vmem:[#allocation45_spill] sm:$0xff] %v2758_v42  ;;  %v2761_v6 = vld [vmem:[%s2502_s13 + $0x53] ss:$4 sm:$0x3]  ;;  %vm2836_vm11 = vcmp.eq.s32.totalorder %v488_v53, 1  ;;  %v2844_v15 = vrot.slane %v2525_v27, %v2537_v30  ;;  %vm2854_vm13 = vcmp.eq.s32.totalorder %v458_v33, 1 }
  0x75   : > { %3693 = vst [vmem:[#allocation46_spill] sm:$0xff] %v2761_v6  ;;  %v2764_v13 = vld [vmem:[%s2502_s13 + $0x5b] ss:$4 sm:$0x3]  ;;  %v714_v57 = vadd.f32 %v2761_v6, %v2734_v55  ;;  %v2812_v6 = vrot.slane %v2530_v28, %v2537_v30  ;;  %3700 = vst [vmem:[#allocation53_spill] sm:$0xff] %v2816_v41 }
  0x76   : > { %3694 = vst [vmem:[#allocation47_spill] sm:$0xff] %v2764_v13  ;;  %v2775_v10 = vld [vmem:[%s2502_s13 + $0x63] ss:$4 sm:$0x3]  ;;  %v715_v1 = vadd.f32 %v2764_v13, %v2737_v54  ;;  %v454_v54 = vrot.slane %v2543_v32, %v2537_v30  ;;  %3705 = vst [vmem:[#allocation54_spill] sm:$0xff] %v2844_v15 }
  0x77   : > { %3695 = vst [vmem:[#allocation48_spill] sm:$0xff] %v2775_v10  ;;  %v2778_v11 = vld [vmem:[%s2502_s13 + $0x6b] ss:$4 sm:$0x3]  ;;  %v716_v40 = vadd.f32 %v2775_v10, %v2749_v43  ;;  %3699 = vst [vmem:[#allocation52_spill] sm:$0xff] %v2812_v6  ;;  %v730_v3 = vmul.f32 %v714_v57, %v698_v16  ;;  %v2848_v16 = vrot.slane %v2525_v27, %v2540_v31 }
  0x78   : > { %3696 = vst [vmem:[#allocation49_spill] sm:$0xff] %v2778_v11  ;;  %v2789_v34 = vld [vmem:[%s2502_s13 + $0x73] ss:$4 sm:$0x3]  ;;  %v717_v62 = vadd.f32 %v2778_v11, %v2752_v50  ;;  %v731_v4 = vmul.f32 %v715_v1, %v699_v9  ;;  %v1375_v11 = vrot.slane %v1347_v7, %v2722_v8  ;;  %vm2850_vm12 = vcmp.eq.s32.totalorder %v454_v54, 1 }
  0x79   : > { %3697 = vst [vmem:[#allocation50_spill] sm:$0xff] %v2789_v34  ;;  %v2792_v22 = vld [vmem:[%s2502_s13 + $0x7b] ss:$4 sm:$0x3]  ;;  %v718_v0 = vadd.f32 %v2789_v34, %v2755_v49  ;;  %v1368_v34 = vrot.slane %v1346_v48, %v2722_v8  ;;  %v732_v28 = vmul.f32 %v716_v40, %v700_v12  ;;  %v1410_v40 = vcombine.low %v728_v58, %v729_v29  ;;  %s2093_s13 = sshll.u32 %s2498_s29, 5 }
  0x7a   : > { %3698 = vst [vmem:[#allocation51_spill] sm:$0xff] %v2792_v22  ;;  %v719_v51 = vadd.f32 %v2792_v22, %v2758_v42  ;;  %v1361_v22 = vrot.slane %v1345_v20, %v2722_v8  ;;  %v733_v10 = vmul.f32 %v717_v62, %v701_v24  ;;  %v1411_v62 = vcombine.low %v730_v3, %v731_v4  ;;  %s3497_s19 = scalar_lea.vmem [#allocation5], %s2093_s13 }
  0x7b   : > { %v734_v13 = vmul.f32 %v718_v0, %v702_v25  ;;  %v1378_v21 = vcombine.low %v1368_v34, %v1375_v11  ;;  %v1379_v23 = vcombine.high %v1368_v34, %v1375_v11  ;;  %3706 = vst [vmem:[#allocation55_spill] sm:$0xff] %v2848_v16  ;;  %v1420_v27 = vrot.slane %v1410_v40, %v2722_v8  ;;  %s1975_s20 = sshll.u32 %s3497_s19, 4  ;;  %s3521_s20 = int_to_ptr.vmem [resolvable:$true] %s1975_s20 }
  0x7c   : > { %v735_v42 = vmul.f32 %v719_v51, %v703_v26  ;;  %v1376_v20 = vcombine.low %v1354_v5, %v1361_v22  ;;  %v1377_v32 = vcombine.high %v1354_v5, %v1361_v22  ;;  %v1412_v0 = vcombine.low %v732_v28, %v733_v10  ;;  %s2280_s8 = scalar_lea.vmem %s3521_s20, 512  ;;  %p2287_p10 = scmp.lt.s32.totalorder %s3521_s20, %s2285_s28 }
  0x7d   : > { %v1427_v31 = vrot.slane %v1411_v62, %v2722_v8  ;;  %v2874_v24 = vrot.slane %v1378_v21, %v2722_v8  ;;  %v2880_v26 = vrot.slane %v1379_v23, %v2722_v8  ;;  %p2281_p6 = scmp.ne.s32.totalorder %s3521_s20, %s2280_s8  ;;  %p2288_p0 = scmp.lt.s32.totalorder %s2286_s7, %s2280_s8 }
  0x7e   : > { %v1413_v14 = vcombine.low %v734_v13, %v735_v42  ;;  %v2871_v11 = vrot.slane %v1376_v20, %v2722_v8  ;;  %v2877_v25 = vrot.slane %v1377_v32, %v2722_v8  ;;  %v2883_v34 = vrot.slane %v1412_v0, %v2722_v8 }
  0x7f   : > { %3712 = vst [vmem:[#allocation57_spill] sm:$0xff] %v2874_v24  ;;  %3714 = vst [vmem:[#allocation59_spill] sm:$0xff] %v2880_v26  ;;  %v1443_v40 = vcombine.high %v1420_v27, %v1427_v31  ;;  %p2282_p13 = pnand %p2281_p6, %p3842_p12  ;;  %p2289_p2 = por %p2288_p0, %p2287_p10 }
  0x80   : > { %3711 = vst [vmem:[#allocation56_spill] sm:$0xff] %v2871_v11  ;;  %3713 = vst [vmem:[#allocation58_spill] sm:$0xff] %v2877_v25  ;;  %v2886_v52 = vrot.slane %v1413_v14, %v2722_v8  ;;  %v3737_v25 = vld [vmem:[#allocation12_spill] sm:$0xff] }
  0x81   : > { %3715 = vst [vmem:[#allocation60_spill] sm:$0xff] %v2883_v34  ;;  %p2283_p8 = pneg %p2282_p13 }
  0x82   : > { %3716 = vst [vmem:[#allocation61_spill] sm:$0xff] %v2886_v52 }
  0x83   : > { %p2290_p4 = pnand %p2289_p2, %p2283_p8 }
  0xc1   : > { %v2830_v57 = vpop.permute.xlu0 %441 }
  0xc2   : > { %v472_v1 = vpop.permute.xlu1 %471  ;;  %v446_v2 = vsub.s32 %v2844_v15, %v2830_v57 }
  0xc3   : > { %v476_v51 = vsub.s32 %v2812_v6, %v472_v1  ;;  %v477_v7 = vsub.s32 %v2816_v41, %v472_v1  ;;  %v1442_v1 = vcombine.low %v1420_v27, %v1427_v31  ;;  %v2936_v27 = vrot.slane %v1443_v40, %v2722_v8 }
  0xc4   : > { %v2940_v31 = vsel %vm2850_vm12, 5, %v446_v2 }
  0xc5   : > { %v2860_v22 = vsel %vm2832_vm10, 5, %v476_v51  ;;  %v2864_v30 = vsel %vm2836_vm11, 5, %v477_v7  ;;  %v445_v42 = vpop.permute.xlu0 %444  ;;  %v447_v7 = vsub.s32 %v2848_v16, %v2830_v57  ;;  %v1444_v57 = vcombine.low %v2883_v34, %v2886_v52  ;;  %3720 = vst [vmem:[#allocation65_spill] sm:$0xff] %v2936_v27 }
  0xc6   : > { %v475_v13 = vpop.permute.xlu1 %474  ;;  %v495_v29 = vcvt.s32.f32 %v2860_v22  ;;  %v496_v3 = vcvt.s32.f32 %v2864_v30 }
  0xc7   : > { %v478_v54 = vsub.s32 %v2812_v6, %v475_v13  ;;  %v479_v10 = vsub.s32 %v2816_v41, %v475_v13  ;;  %v2933_v13 = vrot.slane %v1442_v1, %v2722_v8  ;;  %v449_v1 = vsub.s32 %v2848_v16, %v445_v42 }
  0xc9   : > { %v2890_v53 = vsel %vm2832_vm10, 5, %v478_v54  ;;  %v2894_v58 = vsel %vm2836_vm11, 5, %v479_v10  ;;  %v502_v4 = vpop.permute.xlu0 %501  ;;  %3719 = vst [vmem:[#allocation64_spill] sm:$0xff] %v2933_v13  ;;  %v448_v54 = vsub.s32 %v2844_v15, %v445_v42 }
  0xca   : > { %v507_v5 = vpop.permute.xlu1 %506  ;;  %v3624_v28 = vcvt.s32.f32 %v2890_v53  ;;  %v3623_v33 = vcvt.s32.f32 %v2894_v58  ;;  %v2902_v62 = vadd.f32 %v502_v4, %v495_v29  ;;  %v2904_v48 = vadd.f32 %v502_v4, %v496_v3 }
  0xcb   : > { %v2964_v42 = vsel %vm2850_vm12, 5, %v448_v54 }
  0xcc   : > { %v2912_v20 = vadd.f32 %v507_v5, %v3624_v28  ;;  %v2916_v21 = vadd.f32 %v507_v5, %v3623_v33  ;;  %v740_v23 = vcombine.low %v2902_v62, %v2904_v48  ;;  %v741_v0 = vcombine.high %v2902_v62, %v2904_v48  ;;  %3722 = vst [vmem:[#allocation67_spill] sm:$0xff] %v2964_v42 }
  0xcd   : > { %v2947_v5 = vsel %vm2854_vm13, 5, %v447_v7  ;;  %v2960_v7 = vrot.slane %v1444_v57, %v2722_v8  ;;  %v2977_v28 = vsel %vm2854_vm13, 5, %v449_v1 }
  0xce   : > { %3717 = vst [vmem:[#allocation62_spill] sm:$0xff] %v2912_v20  ;;  %3718 = vst [vmem:[#allocation63_spill] sm:$0xff] %v2916_v21  ;;  %v790_v22 = vcombine.low %v2912_v20, %v2916_v21  ;;  %v791_v30 = vcombine.high %v2912_v20, %v2916_v21  ;;  %v748_v10 = vrot.slane %v740_v23, %v2722_v8 }
  0xcf   : > { %v755_v4 = vrot.slane %v741_v0, %v2722_v8  ;;  %3721 = vst [vmem:[#allocation66_spill] sm:$0xff] %v2960_v7  ;;  %3723 = vst [vmem:[#allocation68_spill] sm:$0xff] %v2977_v28 }
  0xd0   : > { %v798_v14 = vrot.slane %v790_v22, %v2722_v8  ;;  %v805_v40 = vrot.slane %v791_v30, %v2722_v8  ;;  %v756_v32 = vcombine.high %v748_v10, %v748_v10  ;;  %v2953_v2 = vrot.slane %v748_v10, %v2722_v8 }
  0xd1   : > { %v757_v51 = vcombine.high %v755_v4, %v755_v4  ;;  %v2956_v33 = vrot.slane %v755_v4, %v2722_v8  ;;  %v515_v4 = vpop.permute.xlu0 %514 }
  0xd2   : > { %v806_v23 = vcombine.high %v798_v14, %v798_v14  ;;  %v807_v0 = vcombine.high %v805_v40, %v805_v40  ;;  %v2967_v22 = vrot.slane %v756_v32, %v2722_v8  ;;  %v2973_v10 = vrot.slane %v798_v14, %v2722_v8 }
  0xd3   : > { %v2970_v30 = vrot.slane %v757_v51, %v2722_v8  ;;  %v786_v57 = vcombine.high %v2953_v2, %v2953_v2  ;;  %v787_v51 = vcombine.high %v2956_v33, %v2956_v33  ;;  %v2992_v12 = vrot.slane %v805_v40, %v2722_v8 }
  0xd4   : > { %v2982_v9 = vrot.slane %v806_v23, %v2722_v8  ;;  %v788_v14 = vcombine.high %v2967_v22, %v2967_v22  ;;  %v2995_v1 = vrot.slane %v807_v0, %v2722_v8  ;;  %v521_v41 = vsub.f32 %v515_v4, %v495_v29 }
  0xd5   : > { %v789_v54 = vcombine.high %v2970_v30, %v2970_v30  ;;  %v522_v23 = vsub.f32 %v515_v4, %v496_v3  ;;  %v836_v15 = vcombine.high %v2973_v10, %v2973_v10  ;;  %v3008_v0 = vmin.f32 %v2557_v38, %v786_v57  ;;  %v519_v4 = vpop.permute.xlu1 %518 }
  0xd6   : > { %v838_v3 = vcombine.high %v2982_v9, %v2982_v9  ;;  %v3015_v16 = vmin.f32 %v2560_v39, %v788_v14  ;;  %v3018_v32 = vmin.f32 %v2581_v46, %v787_v51  ;;  %v837_v38 = vcombine.high %v2992_v12, %v2992_v12 }
  0xd7   : > { %v3021_v27 = vmin.f32 %v2584_v47, %v789_v54  ;;  %v839_v57 = vcombine.high %v2995_v1, %v2995_v1  ;;  %v876_v40 = vcombine.low %v521_v41, %v522_v23  ;;  %v877_v6 = vcombine.high %v521_v41, %v522_v23 }
  0xd8   : > { %v3032_v46 = vmin.f32 %v2675_v18, %v836_v15  ;;  %v3724_v47 = vcvt.s32.f32 %v2890_v53  ;;  %v3726_v14 = vcvt.s32.f32 %v2894_v58  ;;  %v3043_v13 = vmin.f32 %v2678_v19, %v838_v3  ;;  %v531_v18 = vpop.permute.xlu0 %530 }
  0xd9   : > { %v884_v7 = vrot.slane %v876_v40, %v2722_v8  ;;  %v891_v39 = vrot.slane %v877_v6, %v2722_v8  ;;  %v3052_v53 = vmin.f32 %v2704_v63, %v837_v38  ;;  %v3728_v15 = vcvt.s32.f32 %v2964_v42  ;;  %v527_v20 = vpop.permute.xlu1 %526 }
  0xda   : > { %v3036_v51 = vsub.f32 %v519_v4, %v3724_v47  ;;  %v3040_v54 = vsub.f32 %v519_v4, %v3726_v14  ;;  %v3730_v38 = vcvt.s32.f32 %v2977_v28  ;;  %v3743_v28 = vld [vmem:[#allocation14_spill] sm:$0xff] }
  0xdb   : > { %v892_v3 = vcombine.high %v884_v7, %v884_v7  ;;  %v893_v4 = vcombine.high %v891_v39, %v891_v39  ;;  %v900_v47 = vrot.slane %v884_v7, %v2722_v8  ;;  %v907_v40 = vrot.slane %v891_v39, %v2722_v8  ;;  %v3732_v39 = vld [vmem:[#allocation36_spill] sm:$0xff] }
  0xdc   : > { %3725 = vst [vmem:[#allocation69_spill] sm:$0xff] %v3036_v51  ;;  %3727 = vst [vmem:[#allocation70_spill] sm:$0xff] %v3040_v54  ;;  %v926_v58 = vcombine.low %v3036_v51, %v3040_v54  ;;  %v927_v19 = vcombine.high %v3036_v51, %v3040_v54  ;;  %v3064_v63 = vadd.f32 %v531_v18, %v3728_v15 }
  0xdd   : > { %v3068_v29 = vadd.f32 %v531_v18, %v3730_v38  ;;  %v914_v54 = vrot.slane %v892_v3, %v2722_v8  ;;  %v921_v21 = vrot.slane %v893_v4, %v2722_v8  ;;  %v922_v51 = vcombine.high %v900_v47, %v900_v47 }
  0xde   : > { %v934_v6 = vrot.slane %v926_v58, %v2722_v8  ;;  %v941_v14 = vrot.slane %v927_v19, %v2722_v8  ;;  %3729 = vst [vmem:[#allocation71_spill] sm:$0xff] %v3064_v63  ;;  %v923_v7 = vcombine.high %v907_v40, %v907_v40  ;;  %v3073_v52 = vmin.f32 %v3732_v39, %v839_v57  ;;  %v3736_v19 = vld [vmem:[#allocation8_spill] sm:$0xff] }
  0xdf   : > { %3731 = vst [vmem:[#allocation72_spill] sm:$0xff] %v3068_v29  ;;  %v3076_v58 = vadd.f32 %v521_v41, %v2902_v62  ;;  %v3079_v15 = vadd.f32 %v522_v23, %v2904_v48  ;;  %v992_v34 = vmin.f32 %v3736_v19, %v900_v47  ;;  %v924_v18 = vcombine.high %v914_v54, %v914_v54  ;;  %v3740_v48 = vld [vmem:[#allocation9_spill] sm:$0xff]  ;;  %v3741_v47 = vld [vmem:[#allocation10_spill] sm:$0xff] }
  0xe0   : > { %3733 = vst [vmem:[#allocation36_spill] sm:$0xff] %v3073_v52  ;;  %v925_v38 = vcombine.high %v921_v21, %v921_v21  ;;  %v942_v26 = vcombine.high %v934_v6, %v934_v6  ;;  %v943_v3 = vcombine.high %v941_v14, %v941_v14  ;;  %v996_v4 = vmin.f32 %v3737_v25, %v907_v40  ;;  %v3742_v52 = vld [vmem:[#allocation13_spill] sm:$0xff]  ;;  %v3744_v25 = vld [vmem:[#allocation11_spill] sm:$0xff] }
  0xe1   : > { %3734 = vst [vmem:[#allocation73_spill] sm:$0xff] %v3076_v58  ;;  %3735 = vst [vmem:[#allocation74_spill] sm:$0xff] %v3079_v15  ;;  %v1214_v24 = vcombine.low %v3064_v63, %v3068_v29  ;;  %v3738_v57 = vcvt.s32.f32 %v2940_v31  ;;  %v3739_v41 = vcvt.s32.f32 %v2947_v5  ;;  %v993_v23 = vmin.f32 %v3740_v48, %v914_v54  ;;  %v3745_v15 = vld [vmem:[#allocation15_spill] sm:$0xff]  ;;  %v3753_v48 = vld [vmem:[#allocation34_spill] sm:$0xff] }
  0xe2   : > { %v994_v19 = vmin.f32 %v3741_v47, %v922_v51  ;;  %v997_v11 = vmin.f32 %v3742_v52, %v921_v21  ;;  %v998_v42 = vmin.f32 %v3743_v28, %v923_v7  ;;  %v995_v40 = vmin.f32 %v3744_v25, %v924_v18  ;;  %v3750_v18 = vld [vmem:[#allocation37_spill] sm:$0xff]  ;;  %v3754_v47 = vld [vmem:[#allocation38_spill] sm:$0xff] }
  0xe3   : > { %v3087_v39 = vadd.f32 %v527_v20, %v3738_v57  ;;  %v3091_v62 = vadd.f32 %v527_v20, %v3739_v41  ;;  %v999_v58 = vmin.f32 %v3745_v15, %v925_v38  ;;  %v950_v49 = vrot.slane %v934_v6, %v2722_v8 }
  0xe4   : > { %v957_v57 = vrot.slane %v941_v14, %v2722_v8  ;;  %v3746_v20 = vmin.f32 %v2551_v36, %v2953_v2  ;;  %v964_v54 = vrot.slane %v942_v26, %v2722_v8  ;;  %v971_v51 = vrot.slane %v943_v3, %v2722_v8  ;;  %v3748_v14 = vld [vmem:[#allocation32_spill] sm:$0xff] }
  0xe5   : > { %v1215_v52 = vcombine.high %v3064_v63, %v3068_v29  ;;  %v3747_v28 = vmin.f32 %v2575_v44, %v2956_v33  ;;  %v972_v6 = vcombine.high %v950_v49, %v950_v49  ;;  %v1000_v15 = vmin.f32 %v3748_v14, %v950_v49  ;;  %v3797_v29 = vld [vmem:[#allocation29_spill] sm:$0xff] }
  0xe6   : > { %v3104_v41 = vadd.f32 %v992_v34, %v3746_v20  ;;  %v973_v7 = vcombine.high %v957_v57, %v957_v57  ;;  %v3749_v36 = vmin.f32 %v2554_v37, %v2967_v22  ;;  %v3122_v26 = vadd.f32 %v994_v19, %v3008_v0  ;;  %v3752_v0 = vld [vmem:[#allocation33_spill] sm:$0xff] }
  0xe7   : > { %v3113_v21 = vadd.f32 %v996_v4, %v3747_v28  ;;  %v974_v2 = vcombine.high %v964_v54, %v964_v54  ;;  %v1004_v38 = vmin.f32 %v3750_v18, %v957_v57  ;;  %v3126_v3 = vadd.f32 %v995_v40, %v3015_v16  ;;  %v3755_v16 = vld [vmem:[#allocation39_spill] sm:$0xff] }
  0xe8   : > { %v3119_v34 = vadd.f32 %v993_v23, %v3749_v36  ;;  %v3751_v44 = vmin.f32 %v2578_v45, %v2970_v30  ;;  %v3134_v49 = vadd.f32 %v998_v42, %v3018_v32  ;;  %v3137_v37 = vadd.f32 %v999_v58, %v3021_v27  ;;  %v3757_v27 = vld [vmem:[#allocation35_spill] sm:$0xff] }
  0xe9   : > { %v975_v22 = vcombine.high %v971_v51, %v971_v51  ;;  %v1001_v4 = vmin.f32 %v3752_v0, %v964_v54  ;;  %v1002_v23 = vmin.f32 %v3753_v48, %v972_v6  ;;  %v1005_v19 = vmin.f32 %v3754_v47, %v971_v51  ;;  %v3760_v51 = vld [vmem:[#allocation40_spill] sm:$0xff] }
  0xea   : > { %v3131_v33 = vadd.f32 %v997_v11, %v3751_v44  ;;  %v1006_v25 = vmin.f32 %v3755_v16, %v973_v7  ;;  %v3756_v45 = vmin.f32 %v2725_v56, %v2973_v10  ;;  %v1222_v42 = vrot.slane %v1214_v24, %v2722_v8 }
  0xeb   : > { %v1229_v30 = vrot.slane %v1215_v52, %v2722_v8  ;;  %v1003_v32 = vmin.f32 %v3757_v27, %v974_v2  ;;  %v3758_v58 = vmin.f32 %v2740_v59, %v2992_v12  ;;  %v1164_v57 = vcombine.low %v3087_v39, %v3091_v62  ;;  %v3769_v27 = vld [vmem:[#allocation41_spill] sm:$0xff] }
  0xec   : > { %v3146_v11 = vadd.f32 %v1000_v15, %v3756_v45  ;;  %v1165_v20 = vcombine.high %v3087_v39, %v3091_v62  ;;  %v1230_v56 = vcombine.high %v1222_v42, %v1222_v42  ;;  %v3161_v54 = vrot.slane %v1222_v42, %v2722_v8  ;;  %v3782_v45 = vld [vmem:[#allocation23_spill] sm:$0xff] }
  0xed   : > { %v3154_v40 = vadd.f32 %v1004_v38, %v3758_v58  ;;  %v1231_v10 = vcombine.high %v1229_v30, %v1229_v30  ;;  %v3164_v24 = vrot.slane %v1229_v30, %v2722_v8  ;;  %v3167_v52 = vmin.f32 %v3760_v51, %v975_v22  ;;  %v3770_v58 = vld [vmem:[#allocation45_spill] sm:$0xff] }
  0xee   : > { %v3761_v59 = vmin.f32 %v2672_v17, %v2982_v9  ;;  %v1172_v28 = vrot.slane %v1164_v57, %v2722_v8  ;;  %v1179_v6 = vrot.slane %v1165_v20, %v2722_v8  ;;  %v3177_v7 = vadd.f32 %v1002_v23, %v3032_v46  ;;  %v539_v17 = vpop.permute.xlu1 %538 }
  0xef   : > { %3759 = vst [vmem:[#allocation8_spill] sm:$0xff] %v3154_v40  ;;  %v3763_v14 = vmin.f32 %v2701_v35, %v2995_v1  ;;  %v3185_v36 = vrot.slane %v1230_v56, %v2722_v8  ;;  %v3188_v2 = vrot.slane %v1231_v10, %v2722_v8  ;;  %v1260_v9 = vcombine.high %v3161_v54, %v3161_v54  ;;  %v3799_v40 = vld [vmem:[#allocation27_spill] sm:$0xff] }
  0xf0   : > { %v3172_v12 = vadd.f32 %v1001_v4, %v3761_v59  ;;  %3762 = vst [vmem:[#allocation12_spill] sm:$0xff] %v3177_v7  ;;  %v1261_v18 = vcombine.high %v3164_v24, %v3164_v24  ;;  %v1180_v46 = vcombine.high %v1172_v28, %v1172_v28  ;;  %v1181_v38 = vcombine.high %v1179_v6, %v1179_v6 }
  0xf1   : > { %v3182_v15 = vadd.f32 %v1005_v19, %v3763_v14  ;;  %v3195_v44 = vadd.f32 %v1003_v32, %v3043_v13  ;;  %v3198_v35 = vadd.f32 %v1006_v25, %v3052_v53  ;;  %v1262_v1 = vcombine.high %v3185_v36, %v3185_v36  ;;  %v3796_v53 = vld [vmem:[#allocation26_spill] sm:$0xff] }
  0xf2   : > { %v1263_v22 = vcombine.high %v3188_v2, %v3188_v2  ;;  %v1188_v0 = vrot.slane %v1172_v28, %v2722_v8  ;;  %v1195_v4 = vrot.slane %v1179_v6, %v2722_v8  ;;  %v3766_v48 = vcvt.s32.f32 %v2940_v31  ;;  %v543_v10 = vpop.permute.xlu1 %542  ;;  %v3771_v6 = vld [vmem:[#allocation16_spill] sm:$0xff] }
  0xf3   : > { %3764 = vst [vmem:[#allocation9_spill] sm:$0xff] %v3182_v15  ;;  %3765 = vst [vmem:[#allocation10_spill] sm:$0xff] %v3198_v35  ;;  %v3767_v47 = vcvt.s32.f32 %v2947_v5  ;;  %v1202_v16 = vrot.slane %v1180_v46, %v2722_v8  ;;  %v1209_v25 = vrot.slane %v1181_v38, %v2722_v8  ;;  %v3219_v42 = vmin.f32 %v2734_v55, %v1260_v9  ;;  %v3768_v5 = vld [vmem:[#allocation44_spill] sm:$0xff]  ;;  %v3773_v38 = vld [vmem:[#allocation73_spill] sm:$0xff] }
  0xf4   : > { %v545_v23 = vsub.f32 %v539_v17, %v3766_v48  ;;  %v3224_v30 = vmin.f32 %v3768_v5, %v1261_v18  ;;  %v3227_v32 = vmin.f32 %v3769_v27, %v1262_v1  ;;  %v3230_v57 = vmin.f32 %v3770_v58, %v1263_v22  ;;  %v3774_v48 = vld [vmem:[#allocation74_spill] sm:$0xff]  ;;  %v3778_v58 = vld [vmem:[#allocation68_spill] sm:$0xff] }
  0xf5   : > { %v546_v13 = vsub.f32 %v539_v17, %v3767_v47  ;;  %v1210_v20 = vcombine.high %v1188_v0, %v1188_v0  ;;  %v1211_v56 = vcombine.high %v1195_v4, %v1195_v4  ;;  %v1212_v51 = vcombine.high %v1202_v16, %v1202_v16  ;;  %v3772_v17 = vld [vmem:[#allocation22_spill] sm:$0xff]  ;;  %v3775_v47 = vld [vmem:[#allocation67_spill] sm:$0xff] }
  0xf6   : > { %v1213_v59 = vcombine.high %v1209_v25, %v1209_v25  ;;  %v680_v55 = vadd.f32 %v545_v23, %v3087_v39  ;;  %v1280_v14 = vmin.f32 %v3771_v6, %v1188_v0  ;;  %v1284_v9 = vmin.f32 %v3772_v17, %v1195_v4  ;;  %v3781_v39 = vld [vmem:[#allocation17_spill] sm:$0xff]  ;;  %v3784_v6 = vld [vmem:[#allocation19_spill] sm:$0xff]  ;;  %v3785_v17 = vld [vmem:[#allocation24_spill] sm:$0xff] }
  0xf7   : > { %v681_v28 = vadd.f32 %v546_v13, %v3091_v62  ;;  %v1028_v18 = vcombine.low %v545_v23, %v546_v13  ;;  %v1029_v46 = vcombine.high %v545_v23, %v546_v13  ;;  %v3776_v5 = vcvt.s32.f32 %v3775_v47  ;;  %v3783_v13 = vld [vmem:[#allocation18_spill] sm:$0xff] }
  0xf8   : > { %v684_v1 = vmul.f32 %v680_v55, %v3773_v38  ;;  %v3779_v31 = vcvt.s32.f32 %v3778_v58  ;;  %v1281_v62 = vmin.f32 %v3781_v39, %v1202_v16  ;;  %v1285_v0 = vmin.f32 %v3782_v45, %v1209_v25  ;;  %v3788_v25 = vld [vmem:[#allocation57_spill] sm:$0xff]  ;;  %v3791_v39 = vld [vmem:[#allocation59_spill] sm:$0xff] }
  0xf9   : > { %v685_v22 = vmul.f32 %v681_v28, %v3774_v48  ;;  %v3240_v27 = vsub.f32 %v543_v10, %v3776_v5  ;;  %v1036_v4 = vrot.slane %v1028_v18, %v2722_v8  ;;  %v1043_v23 = vrot.slane %v1029_v46, %v2722_v8  ;;  %v3786_v48 = vld [vmem:[#allocation25_spill] sm:$0xff]  ;;  %v3790_v46 = vld [vmem:[#allocation58_spill] sm:$0xff] }
  0xfa   : > { %v3244_v19 = vsub.f32 %v543_v10, %v3779_v31  ;;  %v1282_v55 = vmin.f32 %v3783_v13, %v1210_v20  ;;  %v1283_v28 = vmin.f32 %v3784_v6, %v1212_v51  ;;  %v1286_v38 = vmin.f32 %v3785_v17, %v1211_v56  ;;  %v3787_v10 = vld [vmem:[#allocation56_spill] sm:$0xff] }
  0xfb   : > { %3777 = vst [vmem:[#allocation13_spill] sm:$0xff] %v3240_v27  ;;  %v1287_v47 = vmin.f32 %v3786_v48, %v1213_v59  ;;  %v1044_v5 = vcombine.high %v1036_v4, %v1036_v4  ;;  %v1045_v58 = vcombine.high %v1043_v23, %v1043_v23  ;;  %v1052_v31 = vrot.slane %v1036_v4, %v2722_v8  ;;  %v3793_v17 = vld [vmem:[#allocation20_spill] sm:$0xff] }
  0xfc   : > { %3780 = vst [vmem:[#allocation14_spill] sm:$0xff] %v3244_v19  ;;  %v1059_v16 = vrot.slane %v1043_v23, %v2722_v8  ;;  %v3789_v45 = vcombine.low %v3787_v10, %v3788_v25  ;;  %v3792_v20 = vcombine.low %v3790_v46, %v3791_v39  ;;  %v1078_v56 = vcombine.low %v3240_v27, %v3244_v19  ;;  %v3794_v48 = vld [vmem:[#allocation28_spill] sm:$0xff]  ;;  %v3795_v39 = vld [vmem:[#allocation21_spill] sm:$0xff] }
  0xfd   : > { %v1079_v51 = vcombine.high %v3240_v27, %v3244_v19  ;;  %v1066_v59 = vrot.slane %v1044_v5, %v2722_v8  ;;  %v1073_v4 = vrot.slane %v1045_v58, %v2722_v8  ;;  %v1074_v23 = vcombine.high %v1052_v31, %v1052_v31  ;;  %v3798_v27 = vld [vmem:[#allocation30_spill] sm:$0xff] }
  0xfe   : > { %v3259_v18 = vadd.f32 %v3789_v45, %v684_v1  ;;  %v3264_v13 = vadd.f32 %v3792_v20, %v685_v22  ;;  %v1075_v6 = vcombine.high %v1059_v16, %v1059_v16  ;;  %v1144_v1 = vmin.f32 %v3793_v17, %v1052_v31  ;;  %v3800_v17 = vld [vmem:[#allocation31_spill] sm:$0xff] }
  0xff   : > { %v1148_v10 = vmin.f32 %v3794_v48, %v1059_v16  ;;  %v1086_v25 = vrot.slane %v1078_v56, %v2722_v8  ;;  %v1093_v22 = vrot.slane %v1079_v51, %v2722_v8  ;;  %v1076_v45 = vcombine.high %v1066_v59, %v1066_v59 }
 0x100   : > { %v1077_v46 = vcombine.high %v1073_v4, %v1073_v4  ;;  %v1145_v20 = vmin.f32 %v3795_v39, %v1066_v59  ;;  %v1146_v19 = vmin.f32 %v3796_v53, %v1074_v23  ;;  %v1149_v5 = vmin.f32 %v3797_v29, %v1073_v4 }
 0x101   : > { %v1150_v58 = vmin.f32 %v3798_v27, %v1075_v6  ;;  %v1296_v63 = vadd.f32 %v1280_v14, %v1144_v1  ;;  %v1300_v35 = vadd.f32 %v1284_v9, %v1148_v10  ;;  %v1147_v31 = vmin.f32 %v3799_v40, %v1076_v45  ;;  %v3801_v6 = vld [vmem:[#allocation42_spill] sm:$0xff]  ;;  %v3802_v10 = vld [vmem:[#allocation43_spill] sm:$0xff] }
 0x102   : > { %v1151_v16 = vmin.f32 %v3800_v17, %v1077_v46  ;;  %v1297_v48 = vadd.f32 %v1281_v62, %v1145_v20  ;;  %v1298_v56 = vadd.f32 %v1282_v55, %v1146_v19  ;;  %v1301_v15 = vadd.f32 %v1285_v0, %v1149_v5  ;;  %v3804_v46 = vld [vmem:[#allocation47_spill] sm:$0xff]  ;;  %v3805_v20 = vld [vmem:[#allocation48_spill] sm:$0xff] }
 0x103   : > { %v1302_v51 = vadd.f32 %v1286_v38, %v1150_v58  ;;  %v3283_v7 = vmul.f32 %v1296_v63, %v3104_v41  ;;  %v3286_v59 = vmul.f32 %v1300_v35, %v3113_v21  ;;  %v1299_v53 = vadd.f32 %v1283_v28, %v1147_v31  ;;  %v3806_v58 = vld [vmem:[#allocation49_spill] sm:$0xff] }
 0x104   : > { %v1303_v29 = vadd.f32 %v1287_v47, %v1151_v16  ;;  %v3289_v27 = vmul.f32 %v1297_v48, %v3119_v34  ;;  %v3292_v14 = vmul.f32 %v1298_v56, %v3122_v26  ;;  %v3295_v40 = vmul.f32 %v1301_v15, %v3131_v33 }
 0x105   : > { %v3298_v19 = vmul.f32 %v1302_v51, %v3134_v49  ;;  %v1094_v9 = vcombine.high %v1086_v25, %v1086_v25  ;;  %v1095_v63 = vcombine.high %v1093_v22, %v1093_v22  ;;  %v3301_v41 = vmul.f32 %v1299_v53, %v3126_v3  ;;  %v3807_v51 = vld [vmem:[#allocation50_spill] sm:$0xff] }
 0x106   : > { %v3304_v21 = vmul.f32 %v1303_v29, %v3137_v37  ;;  %v1500_v34 = vcombine.low %v3283_v7, %v3289_v27  ;;  %v1102_v26 = vrot.slane %v1086_v25, %v2722_v8  ;;  %v1502_v33 = vcombine.low %v3286_v59, %v3295_v40  ;;  %v3808_v29 = vld [vmem:[#allocation51_spill] sm:$0xff] }
 0x107   : > { %v1109_v15 = vrot.slane %v1093_v22, %v2722_v8  ;;  %v1116_v49 = vrot.slane %v1094_v9, %v2722_v8  ;;  %v1123_v35 = vrot.slane %v1095_v63, %v2722_v8  ;;  %v1501_v3 = vcombine.low %v3292_v14, %v3301_v41  ;;  %v3803_v22 = vld [vmem:[#allocation46_spill] sm:$0xff] }
 0x108   : > { %v1503_v37 = vcombine.low %v3298_v19, %v3304_v21  ;;  %v1510_v62 = vrot.slane %v1500_v34, %v2722_v8  ;;  %v1124_v0 = vcombine.high %v1102_v26, %v1102_v26  ;;  %v1524_v55 = vrot.slane %v1502_v33, %v2722_v8 }
 0x109   : > { %v1125_v28 = vcombine.high %v1109_v15, %v1109_v15  ;;  %v1126_v38 = vcombine.high %v1116_v49, %v1116_v49  ;;  %v1127_v47 = vcombine.high %v1123_v35, %v1123_v35  ;;  %v1517_v4 = vrot.slane %v1501_v3, %v2722_v8 }
 0x10a   : > { %v1531_v23 = vrot.slane %v1503_v37, %v2722_v8  ;;  %v1152_v1 = vmin.f32 %v3801_v6, %v1102_v26  ;;  %v1153_v25 = vmin.f32 %v3802_v10, %v1116_v49  ;;  %v1154_v45 = vmin.f32 %v3803_v22, %v1124_v0 }
 0x10b   : > { %v1155_v39 = vmin.f32 %v3804_v46, %v1126_v38  ;;  %v1156_v5 = vmin.f32 %v3805_v20, %v1109_v15  ;;  %v1157_v31 = vmin.f32 %v3806_v58, %v1123_v35  ;;  %v1532_v17 = vcombine.low %v1510_v62, %v1517_v4  ;;  %v3822_v20 = vld [vmem:[#allocation13_spill] sm:$0xff]  ;;  %v3823_v58 = vld [vmem:[#allocation72_spill] sm:$0xff] }
 0x10c   : > { %v1533_v16 = vcombine.high %v1510_v62, %v1517_v4  ;;  %v1534_v48 = vcombine.low %v1524_v55, %v1531_v23  ;;  %v1535_v56 = vcombine.high %v1524_v55, %v1531_v23  ;;  %v1158_v53 = vmin.f32 %v3807_v51, %v1125_v28  ;;  %v3826_v51 = vld [vmem:[#allocation69_spill] sm:$0xff] }
 0x10d   : > { %v1159_v9 = vmin.f32 %v3808_v29, %v1127_v47  ;;  %v3809_v63 = vmin.f32 %v2728_v61, %v3161_v54  ;;  %v3810_v26 = vmin.f32 %v2731_v60, %v3185_v36  ;;  %v1542_v15 = vrot.slane %v1532_v17, %v2722_v8  ;;  %v3813_v47 = vld [vmem:[#allocation36_spill] sm:$0xff] }
 0x10e   : > { %v1549_v49 = vrot.slane %v1533_v16, %v2722_v8  ;;  %v1556_v35 = vrot.slane %v1534_v48, %v2722_v8  ;;  %v1563_v3 = vrot.slane %v1535_v56, %v2722_v8  ;;  %v1306_v37 = vadd.f32 %v3219_v42, %v1154_v45  ;;  %v3825_v56 = vld [vmem:[#allocation62_spill] sm:$0xff] }
 0x10f   : > { %v1304_v34 = vadd.f32 %v3809_v63, %v1152_v1  ;;  %v1305_v33 = vadd.f32 %v3810_v26, %v1153_v25  ;;  %v1307_v62 = vadd.f32 %v3227_v32, %v1155_v39  ;;  %v3811_v61 = vmin.f32 %v2749_v43, %v3164_v24  ;;  %v3821_v39 = vld [vmem:[#allocation71_spill] sm:$0xff] }
 0x110   : > { %v3812_v60 = vmin.f32 %v2752_v50, %v3188_v2  ;;  %v1564_v0 = vcombine.low %v1542_v15, %v1556_v35  ;;  %v1565_v55 = vcombine.low %v1549_v49, %v1563_v3  ;;  %v1310_v28 = vadd.f32 %v3224_v30, %v1158_v53  ;;  %v3814_v2 = vld [vmem:[#allocation12_spill] sm:$0xff]  ;;  %v3827_v63 = vld [vmem:[#allocation63_spill] sm:$0xff]  ;;  %v3829_v49 = vld [vmem:[#allocation66_spill] sm:$0xff] }
 0x111   : > { %v1308_v54 = vadd.f32 %v3811_v61, %v1156_v5  ;;  %v1311_v38 = vadd.f32 %v3230_v57, %v1159_v9  ;;  %v1023_v4 = vadd.f32 %v3167_v52, %v3813_v47  ;;  %v3353_v42 = vmul.f32 %v1304_v34, %v3146_v11  ;;  %v3815_v57 = vld [vmem:[#allocation9_spill] sm:$0xff]  ;;  %v3816_v52 = vld [vmem:[#allocation60_spill] sm:$0xff]  ;;  %v3828_v34 = vld [vmem:[#allocation70_spill] sm:$0xff] }
 0x112   : > { %v1309_v36 = vadd.f32 %v3812_v60, %v1157_v31  ;;  %v3356_v32 = vmul.f32 %v1305_v33, %v3172_v12  ;;  %v3359_v43 = vmul.f32 %v1307_v62, %v3195_v44  ;;  %v1636_v50 = vsub.f32 %v3259_v18, %v1564_v0  ;;  %v3817_v11 = vld [vmem:[#allocation61_spill] sm:$0xff]  ;;  %v3819_v12 = vld [vmem:[#allocation8_spill] sm:$0xff]  ;;  %v3820_v44 = vld [vmem:[#allocation10_spill] sm:$0xff] }
 0x113   : > { %v1637_v24 = vsub.f32 %v3264_v13, %v1565_v55  ;;  %v3364_v30 = vmul.f32 %v1306_v37, %v3814_v2  ;;  %v3818_v6 = vcombine.high %v3816_v52, %v3817_v11  ;;  %v3374_v10 = vmul.f32 %v1308_v54, %v3819_v12  ;;  %v3824_v31 = vld [vmem:[#allocation14_spill] sm:$0xff]  ;;  %v3830_v35 = vld [vmem:[#allocation64_spill] sm:$0xff]  ;;  %v3831_v37 = vld [vmem:[#allocation65_spill] sm:$0xff] }
 0x114   : > { %v3367_v23 = vmul.f32 %v1309_v36, %v3815_v57  ;;  %v3377_v25 = vmul.f32 %v1310_v28, %v3820_v44  ;;  %v3379_v18 = vmul.f32 %v1311_v38, %v1023_v4  ;;  %v1656_v13 = vadd.f32 1.0, %v1636_v50  ;;  %v3408_v50 = vpop.permute.xlu1 %383 }
 0x115   : > { %v1473_v1 = vrot.slane %v3818_v6, %v2722_v8  ;;  %v1657_v22 = vadd.f32 1.0, %v1637_v24  ;;  %v1566_v45 = vcombine.low %v3353_v42, %v3356_v32  ;;  %v1567_v46 = vcombine.low %v3364_v30, %v3359_v43 }
 0x116   : > { %v682_v5 = vadd.f32 %v3822_v20, %v3821_v39  ;;  %v683_v17 = vadd.f32 %v3824_v31, %v3823_v58  ;;  %v1568_v16 = vcombine.low %v3374_v10, %v3367_v23  ;;  %v1569_v48 = vcombine.low %v3377_v25, %v3379_v18  ;;  %v381_v39 = vpop.permute.xlu0 %380  ;;  %v3832_v58 = vld [vmem:[#allocation54_spill] sm:$0xff]  ;;  %v3833_v31 = vld [vmem:[#allocation55_spill] sm:$0xff] }
 0x117   : > { %v678_v53 = vadd.f32 %v3826_v51, %v3825_v56  ;;  %2242 = vrcp.f32 %v1656_v13  ;;  %v1576_v29 = vrot.slane %v1566_v45, %v2722_v8  ;;  %v1583_v9 = vrot.slane %v1567_v46, %v2722_v8 }
 0x118   : > { %v679_v26 = vadd.f32 %v3828_v34, %v3827_v63  ;;  %2244 = vrcp.f32 %v1657_v22  ;;  %v1590_v33 = vrot.slane %v1568_v16, %v2722_v8  ;;  %v1597_v15 = vrot.slane %v1569_v48, %v2722_v8  ;;  %v3410_v22 = vpop.permute.xlu1 %390  ;;  %v3834_v34 = vld [vmem:[#allocation52_spill] sm:$0xff] }
 0x119   : > { %v1474_v3 = vcombine.low %v3830_v35, %v3829_v49  ;;  %v1475_v62 = vcombine.low %v3831_v37, %v1473_v1  ;;  %v1598_v61 = vcombine.low %v1576_v29, %v1583_v9  ;;  %v1599_v54 = vcombine.high %v1576_v29, %v1583_v9 }
 0x11a   : > { %v686_v60 = vmul.f32 %v682_v5, %v678_v53  ;;  %v687_v36 = vmul.f32 %v683_v17, %v679_v26  ;;  %v1600_v0 = vcombine.low %v1590_v33, %v1597_v15  ;;  %v1601_v55 = vcombine.high %v1590_v33, %v1597_v15 }
 0x11b   : > { %v1608_v28 = vrot.slane %v1598_v61, %v2722_v8  ;;  %v1615_v38 = vrot.slane %v1599_v54, %v2722_v8  ;;  %vm385_vm14 = vcmp.ge.s32.totalorder %v3832_v58, %v381_v39  ;;  %vm395_vm15 = vcmp.le.s32.totalorder %v3832_v58, %v3410_v22  ;;  %v3835_v61 = vld [vmem:[#allocation53_spill] sm:$0xff] }
 0x11c   : > { %v1622_v47 = vrot.slane %v1600_v0, %v2722_v8  ;;  %v1629_v4 = vrot.slane %v1601_v55, %v2722_v8  ;;  %v1482_v24 = vadd.f32 %v1474_v3, %v686_v60  ;;  %v1483_v2 = vadd.f32 %v1475_v62, %v687_v36  ;;  %v413_v51 = vpop.permute.xlu1 %412  ;;  %vm3446_vm4 = vmand %vm385_vm14, %vm395_vm15 }
 0x11d   : > { %vm386_vm0 = vcmp.ge.s32.totalorder %v3833_v31, %v381_v39  ;;  %vm396_vm1 = vcmp.le.s32.totalorder %v3833_v31, %v3410_v22  ;;  %v1640_v53 = vadd.f32 1.0, %v3283_v7  ;;  %v1641_v29 = vadd.f32 1.0, %v3289_v27 }
 0x11e   : > { %v1630_v57 = vcombine.low %v1608_v28, %v1622_v47  ;;  %v1631_v52 = vcombine.low %v1615_v38, %v1629_v4  ;;  %v1642_v9 = vadd.f32 1.0, %v3292_v14  ;;  %v1643_v63 = vadd.f32 1.0, %v3301_v41  ;;  %vm3459_vm5 = vmand %vm386_vm0, %vm396_vm1 }
 0x11f   : > { %vm417_vm2 = vcmp.ge.s32.totalorder %v3834_v34, %v413_v51  ;;  %v1644_v35 = vadd.f32 1.0, %v3286_v59  ;;  %v1645_v3 = vadd.f32 1.0, %v3295_v40  ;;  %v1646_v7 = vadd.f32 1.0, %v3298_v19 }
 0x120   : > { %v1638_v11 = vsub.f32 %v1482_v24, %v1630_v57  ;;  %v1639_v6 = vsub.f32 %v1483_v2, %v1631_v52  ;;  %v1647_v27 = vadd.f32 1.0, %v3304_v21  ;;  %vm418_vm3 = vcmp.ge.s32.totalorder %v3835_v61, %v413_v51  ;;  %v427_v57 = vpop.permute.xlu1 %426  ;;  %vm421_vm8 = vmand %vm3446_vm4, %vm417_vm2 }
 0x121   : > { %v2243_v1 = vpop.eup %2242  ;;  %v1648_v40 = vadd.f32 1.0, %v3353_v42  ;;  %v1649_v19 = vadd.f32 1.0, %v3356_v32  ;;  %v1650_v21 = vadd.f32 1.0, %v3364_v30  ;;  %v1651_v24 = vadd.f32 1.0, %v3359_v43  ;;  %vm3478_vm9 = vmand %vm3459_vm5, %vm418_vm3 }
 0x122   : > { %v2245_v12 = vpop.eup %2244  ;;  %v1658_v44 = vadd.f32 1.0, %v1638_v11  ;;  %v1659_v13 = vadd.f32 1.0, %v1639_v6  ;;  %v1652_v2 = vadd.f32 1.0, %v3374_v10  ;;  %v1653_v6 = vadd.f32 1.0, %v3367_v23  ;;  %v394_v10 = vpop.permute.xlu0 %393 }
 0x123   : > { %v1668_v45 = vcombine.low %v2243_v1, %v2245_v12  ;;  %v1669_v46 = vcombine.high %v2243_v1, %v2245_v12  ;;  %v1654_v1 = vadd.f32 1.0, %v3377_v25  ;;  %vm431_vm6 = vcmp.le.s32.totalorder %v3834_v34, %v427_v57 }
 0x124   : > { %2246 = vrcp.f32 %v1658_v44  ;;  %vm432_vm7 = vcmp.le.s32.totalorder %v3835_v61, %v427_v57  ;;  %vm435_vm10 = vmand %vm421_vm8, %vm431_vm6  ;;  %vm387_vm12 = vcmp.ge.s32.totalorder %v3832_v58, %v3408_v50  ;;  %vm397_vm13 = vcmp.le.s32.totalorder %v3832_v58, %v394_v10 }
 0x125   : > { %2248 = vrcp.f32 %v1659_v13  ;;  %v1676_v20 = vrot.slane %v1668_v45, %v2722_v8  ;;  %v1683_v5 = vrot.slane %v1669_v46, %v2722_v8  ;;  %vm436_vm11 = vmand %vm3478_vm9, %vm432_vm7  ;;  %vm388_vm14 = vcmp.ge.s32.totalorder %v3833_v31, %v3408_v50 }
 0x126   : > { %vm398_vm15 = vcmp.le.s32.totalorder %v3833_v31, %v394_v10  ;;  %vm401_vm1 = vmand %vm387_vm12, %vm397_vm13 }
 0x127   : > { %v1684_v17 = vcombine.high %v1676_v20, %v1676_v20  ;;  %v1685_v16 = vcombine.high %v1683_v5, %v1683_v5  ;;  %v1692_v48 = vrot.slane %v1676_v20, %v2722_v8  ;;  %v1699_v56 = vrot.slane %v1683_v5, %v2722_v8  ;;  %vm402_vm2 = vmand %vm388_vm14, %vm398_vm15 }
 0x129   : > { %v1706_v26 = vrot.slane %v1684_v17, %v2722_v8  ;;  %v1713_v33 = vrot.slane %v1685_v16, %v2722_v8  ;;  %v1714_v15 = vcombine.high %v1692_v48, %v1692_v48  ;;  %v1715_v49 = vcombine.high %v1699_v56, %v1699_v56 }
 0x12a   : > { %v1784_v62 = vmul.f32 %v1692_v48, %v1640_v53  ;;  %v1788_v60 = vmul.f32 %v1699_v56, %v1644_v35 }
 0x12b   : > { %v1716_v37 = vcombine.high %v1706_v26, %v1706_v26  ;;  %v1717_v14 = vcombine.high %v1713_v33, %v1713_v33  ;;  %v1785_v41 = vmul.f32 %v1706_v26, %v1641_v29  ;;  %v1786_v54 = vmul.f32 %v1714_v15, %v1642_v9 }
 0x12c   : > { %v1789_v36 = vmul.f32 %v1713_v33, %v1645_v3  ;;  %v1790_v55 = vmul.f32 %v1715_v49, %v1646_v7  ;;  %v1655_v49 = vadd.f32 1.0, %v3379_v18 }
 0x12d   : > { %v1787_v0 = vmul.f32 %v1716_v37, %v1643_v63  ;;  %v1791_v28 = vmul.f32 %v1717_v14, %v1647_v27  ;;  %v1816_v38 = vcombine.low %v1784_v62, %v1785_v41  ;;  %v416_v27 = vpop.permute.xlu0 %415 }
 0x12e   : > { %v2247_v59 = vpop.eup %2246  ;;  %v1818_v47 = vcombine.low %v1788_v60, %v1789_v36  ;;  %vm419_vm0 = vcmp.ge.s32.totalorder %v3834_v34, %v416_v27  ;;  %vm420_vm3 = vcmp.ge.s32.totalorder %v3835_v61, %v416_v27 }
 0x12f   : > { %v2249_v4 = vpop.eup %2248  ;;  %v1817_v52 = vcombine.low %v1786_v54, %v1787_v0  ;;  %v1819_v11 = vcombine.low %v1790_v55, %v1791_v28  ;;  %v1826_v32 = vrot.slane %v1816_v38, %v2722_v8  ;;  %vm423_vm4 = vmand %vm401_vm1, %vm419_vm0 }
 0x130   : > { %v1718_v12 = vcombine.low %v2247_v59, %v2249_v4  ;;  %v1719_v44 = vcombine.high %v2247_v59, %v2249_v4  ;;  %v1840_v30 = vrot.slane %v1818_v47, %v2722_v8  ;;  %vm424_vm7 = vmand %vm402_vm2, %vm420_vm3 }
 0x131   : > { %v1833_v43 = vrot.slane %v1817_v52, %v2722_v8  ;;  %v1847_v23 = vrot.slane %v1819_v11, %v2722_v8 }
 0x132   : > { %v1726_v13 = vrot.slane %v1718_v12, %v2722_v8  ;;  %v1733_v45 = vrot.slane %v1719_v44, %v2722_v8 }
 0x133   : > { %v1848_v46 = vcombine.low %v1826_v32, %v1833_v43  ;;  %v1849_v20 = vcombine.high %v1826_v32, %v1833_v43  ;;  %v1850_v5 = vcombine.low %v1840_v30, %v1847_v23  ;;  %v1851_v17 = vcombine.high %v1840_v30, %v1847_v23 }
 0x134   : > { %v1734_v22 = vcombine.high %v1726_v13, %v1726_v13  ;;  %v1735_v16 = vcombine.high %v1733_v45, %v1733_v45  ;;  %v1742_v39 = vrot.slane %v1726_v13, %v2722_v8  ;;  %v1749_v48 = vrot.slane %v1733_v45, %v2722_v8 }
 0x135   : > { %v1858_v53 = vrot.slane %v1848_v46, %v2722_v8  ;;  %v1865_v29 = vrot.slane %v1849_v20, %v2722_v8  ;;  %v1872_v9 = vrot.slane %v1850_v5, %v2722_v8  ;;  %v1879_v63 = vrot.slane %v1851_v17, %v2722_v8 }
 0x136   : > { %v1756_v26 = vrot.slane %v1734_v22, %v2722_v8  ;;  %v1763_v33 = vrot.slane %v1735_v16, %v2722_v8  ;;  %v1764_v15 = vcombine.high %v1742_v39, %v1742_v39  ;;  %v1765_v51 = vcombine.high %v1749_v48, %v1749_v48 }
 0x137   : > { %v1792_v35 = vmul.f32 %v1742_v39, %v1648_v40  ;;  %v1880_v3 = vcombine.low %v1858_v53, %v1872_v9  ;;  %v1881_v7 = vcombine.low %v1865_v29, %v1879_v63  ;;  %v1796_v41 = vmul.f32 %v1749_v48, %v1652_v2 }
 0x138   : > { %v1766_v37 = vcombine.high %v1756_v26, %v1756_v26  ;;  %v1767_v14 = vcombine.high %v1763_v33, %v1763_v33  ;;  %v1793_v62 = vmul.f32 %v1756_v26, %v1649_v19  ;;  %v1794_v54 = vmul.f32 %v1764_v15, %v1650_v21  ;;  %v430_v21 = vpop.permute.xlu0 %429 }
 0x139   : > { %v1797_v60 = vmul.f32 %v1763_v33, %v1653_v6  ;;  %v1952_v18 = vsel %vm435_vm10, %v1880_v3, -1.0  ;;  %v1953_v36 = vsel %vm436_vm11, %v1881_v7, -1.0  ;;  %v1798_v55 = vmul.f32 %v1765_v51, %v1654_v1 }
 0x13a   : > { %v1795_v0 = vmul.f32 %v1766_v37, %v1651_v24  ;;  %v1799_v28 = vmul.f32 %v1767_v14, %v1655_v49  ;;  %v1882_v38 = vcombine.low %v1792_v35, %v1793_v62  ;;  %1956 = vst [vmem:[%s3497_s19] sm:$0xff] %v1952_v18  ;;  %1957 = vst [vmem:[%s3497_s19 + $0x8] sm:$0xff] %v1953_v36 }
 0x13b   : > { %v1884_v59 = vcombine.low %v1796_v41, %v1797_v60  ;;  %vm433_vm5 = vcmp.le.s32.totalorder %v3834_v34, %v430_v21  ;;  %vm434_vm6 = vcmp.le.s32.totalorder %v3835_v61, %v430_v21 }
 0x13c   : > { %v1883_v40 = vcombine.low %v1794_v54, %v1795_v0  ;;  %v1885_v19 = vcombine.low %v1798_v55, %v1799_v28  ;;  %v1892_v47 = vrot.slane %v1882_v38, %v2722_v8  ;;  %vm437_vm8 = vmand %vm423_vm4, %vm433_vm5 }
 0x13d   : > { %v1906_v24 = vrot.slane %v1884_v59, %v2722_v8  ;;  %vm438_vm9 = vmand %vm424_vm7, %vm434_vm6 }
 0x13e   : > { %v1899_v4 = vrot.slane %v1883_v40, %v2722_v8  ;;  %v1913_v58 = vrot.slane %v1885_v19, %v2722_v8 }
 0x140   : > { %v1914_v50 = vcombine.low %v1892_v47, %v1899_v4  ;;  %v1915_v31 = vcombine.high %v1892_v47, %v1899_v4  ;;  %v1916_v2 = vcombine.low %v1906_v24, %v1913_v58  ;;  %v1917_v57 = vcombine.high %v1906_v24, %v1913_v58 }
 0x142   : > { %v1924_v52 = vrot.slane %v1914_v50, %v2722_v8  ;;  %v1931_v11 = vrot.slane %v1915_v31, %v2722_v8  ;;  %v1938_v6 = vrot.slane %v1916_v2, %v2722_v8  ;;  %v1945_v1 = vrot.slane %v1917_v57, %v2722_v8 }
 0x144   : > { %v1946_v34 = vcombine.low %v1924_v52, %v1938_v6  ;;  %v1947_v61 = vcombine.low %v1931_v11, %v1945_v1 }
 0x146   : > { %v1954_v12 = vsel %vm437_vm8, %v1946_v34, -1.0  ;;  %v1955_v44 = vsel %vm438_vm9, %v1947_v61, -1.0 }
 0x147   : > { %1958 = vst [vmem:[%s3497_s19 + $0x10] sm:$0xff] %v1954_v12  ;;  %1959 = vst [vmem:[%s3497_s19 + $0x18] sm:$0xff] %v1955_v44 }
 0x148   : > { %2293 = shalt.err (!%p2290_p4)
}
 0x149   : > { %s2294_s12 = scalar_lea.hbm %s3526_s15, 512  ;;  %s2298_s13 = scalar_lea.hbm %s3578_s6, 1024 }
 0x14a   : > { %p2295_p5 = scmp.ne.s32.totalorder %s3526_s15, %s2294_s12  ;;  %p2299_p1 = scmp.lt.u32.totalorder %s3526_s15, %s3578_s6 }
 0x14b   : > { %p2300_p3 = scmp.lt.u32.totalorder %s2298_s13, %s2294_s12  ;;  %p2302_p6 = scmp.lt.u32.totalorder %s2294_s12, %s3526_s15 }
 0x14c   : > { %p2296_p7 = pnand %p2295_p5, %p3842_p12 }
 0x14d   : > { %p2301_p11 = por %p2300_p3, %p2299_p1 }
 0x14e   : > { %p2297_p9 = pneg %p2296_p7 }
 0x14f   : > { %p2303_p13 = por %p2302_p6, %p2301_p11 }
 0x151   : > { %p2304_p8 = pnand %p2303_p13, %p2297_p9 }
 0x153   : > { %2307 = shalt.err (!%p2304_p8)
}
 0x154   : > { %s2357_s14 = smov 256   ;;  %s2358_s25 = smov 16  }
 0x155   : > { %2179 = dma.vmem_to_hbm [thread:$0]  (%p3842_p12), %s3521_s20, 512, %s3526_s15, %s1961_s17, %s2357_s14, %s2357_s14, %s2358_s25  }
 0x156 PF: > { %s1990_s8 = sand.u32 1, %s2334_s21   ;;  %p3843_p10 = scmp.ne.s32.totalorder %s3653_s10, 0 }
 0x157   : > { %p3844_p0 = scmp.ge.s32.totalorder %s2346_s24, 2  ;;  %s1991_s26 = scalar_lea.sflag [#allocation4], %s1990_s8 }
 0x159   : > { %p2186_p2 = pnand %p3844_p0, %p3843_p10 }
 0x15b   : > { %2329 = dma.done.wait (!%p2186_p2), %s1991_s26, 512  }
 0x15c   : > { %2331 = vsyncadd (!%p2186_p2), %s1991_s26, 4294966784  ;;  %p19_p4 = scmp.ge.s32.totalorder %s2419_s27, 4   ;;  %s3845_s21 = smov %s2338_s22 }
 0x15d   : > { %s3846_s22 = smov %s2342_s23  ;;  %s3847_s23 = smov %s2431_s30 }
 0x15e   : > { %s3848_s24 = smov %s2419_s27  ;;  %21 = sbr.rel (!%p19_p4) target bundleno = 5 (0x5), region = 161 }
 0x165   :  { %1996 = vsyncpa [#allocation3], 1 }
 0x166   :  { %1998 = vsyncpa [#allocation3 + $0x1], 1 }
 0x167   :  { %1999 = vsyncpa [#allocation4], 1 }
 0x168   :  { %2001 = vsyncpa [#allocation4 + $0x1], 1 }

</bundles_post_ra>
